<compile_context>
chip_gen: v7x
topology: tpu7x:2x2x1
jax: 0.10.0
libtpu: 0.0.40
codegen_flags: <defaults>
</compile_context>

<pallas_src>
from functools import partial

import jax
import jax.numpy as jnp
from jax.experimental import pallas as pl
from jax.experimental.pallas import tpu as pltpu


# ---- config (mirrors the PyTorch `config.l0/l1/l2`) ----
class config:
    l0 = 32   # input features
    l1 = 64   # hidden 1
    l2 = 32   # hidden 2


def _mlp_kernel(x_ref, w1_ref, b1_ref, w2_ref, b2_ref, w3_ref, b3_ref, o_ref):
    # x_ref: [TB, l0] f32 in natural layout.  Flip batch onto the lane axis and cast
    # to bf16 in-kernel (XLU/VPU are idle in this DMA-bound kernel).
    xt = jnp.transpose(x_ref[...]).astype(w1_ref.dtype)          # [l0, TB] bf16

    # Layer 1: h1 = relu(W1 @ x^T + b1) -> [l1, TB]; MXU with f32 accumulation.
    h1 = jnp.dot(w1_ref[...], xt, preferred_element_type=jnp.float32)
    h1 = jnp.maximum(h1 + b1_ref[...], 0.0)

    # Layer 2: h2 = relu(W2 @ h1 + b2) -> [l2, TB]
    h2 = jnp.dot(w2_ref[...], h1.astype(w2_ref.dtype),
                 preferred_element_type=jnp.float32)
    h2 = jnp.maximum(h2 + b2_ref[...], 0.0)

    # Layer 3 (out_features == 1): VPU multiply + sublane reduce instead of an N=1
    # matmul; result is a lane-dense [1, TB] row.  b3 is a scalar from SMEM.
    out = jnp.sum(h2 * w3_ref[...], axis=0, keepdims=True) + b3_ref[0, 0]
    o_ref[...] = out.astype(o_ref.dtype)


@partial(jax.jit, static_argnames=("block_b",))
def mlp_forward(x, params, *, block_b=8192):
    """x: [B, l0] float32 -> [B, 1] float32."""
    B, l0 = x.shape
    assert l0 == config.l0
    assert block_b % 128 == 0, "block_b must be a multiple of 128 (lane-dense output)"

    num_tiles = pl.cdiv(B, block_b)
    B_pad = num_tiles * block_b
    if B_pad != B:
        # Zero-pad the batch; padded rows are computed and sliced off (cheap, fused
        # under jit).  For best perf pick B as a multiple of block_b.
        x = jnp.pad(x, ((0, B_pad - B), (0, 0)))

    w1 = params["w1"].astype(jnp.bfloat16)    # [l1, l0]
    w2 = params["w2"].astype(jnp.bfloat16)    # [l2, l1]
    b1 = params["b1"]                         # [l1, 1] f32
    b2 = params["b2"]                         # [l2, 1] f32
    w3 = params["w3"]                         # [l2, 1] f32 (column, used on the VPU)
    b3 = params["b3"]                         # [1, 1]  f32 (scalar, via SMEM)

    resident = lambda shape: pl.BlockSpec(shape, lambda i: (0, 0))

    out_t = pl.pallas_call(
        _mlp_kernel,
        out_shape=jax.ShapeDtypeStruct((1, B_pad), jnp.float32),
        grid=(num_tiles,),
        in_specs=[
            pl.BlockSpec((block_b, l0), lambda i: (i, 0)),        # x batch tile (natural layout)
            resident(w1.shape),                                   # W1 (stays in VMEM)
            resident(b1.shape),                                   # b1
            resident(w2.shape),                                   # W2
            resident(b2.shape),                                   # b2
            resident(w3.shape),                                   # w3 column
            pl.BlockSpec((1, 1), lambda i: (0, 0),
                         memory_space=pltpu.MemorySpace.SMEM),    # b3 scalar
        ],
        out_specs=pl.BlockSpec((1, block_b), lambda i: (0, i)),   # lane-dense output slab
        compiler_params=pltpu.CompilerParams(
            dimension_semantics=("parallel",),                    # megacore on v7x
            vmem_limit_bytes=32 * 1024 * 1024,                    # headroom over v5e default
        ),
    )(x, w1, b1, w2, b2, w3, b3)

    # [1, B_pad] -> [B, 1]
    return out_t[0, :B].reshape(B, 1)


def init_params(key):
    """Deterministic init matching nn.Linear(l0,l1), nn.Linear(l1,l2), nn.Linear(l2,1).
    w1/w2 are stored PyTorch-style as [out, in]; w3 is stored as a column [l2, 1]."""
    k1, k2, k3, k4, k5, k6 = jax.random.split(key, 6)
    s1 = 1.0 / jnp.sqrt(config.l0)
    s2 = 1.0 / jnp.sqrt(config.l1)
    s3 = 1.0 / jnp.sqrt(config.l2)
    return {
        "w1": jax.random.uniform(k1, (config.l1, config.l0), jnp.float32, -s1, s1),
        "b1": jax.random.uniform(k2, (config.l1, 1), jnp.float32, -s1, s1),
        "w2": jax.random.uniform(k3, (config.l2, config.l1), jnp.float32, -s2, s2),
        "b2": jax.random.uniform(k4, (config.l2, 1), jnp.float32, -s2, s2),
        "w3": jax.random.uniform(k5, (config.l2, 1), jnp.float32, -s3, s3),
        "b3": jax.random.uniform(k6, (1, 1), jnp.float32, -s3, s3),
    }


def mlp_reference(x, p, compute_dtype=jnp.bfloat16):
    """Pure-JAX reference mirroring the kernel's numerics (bf16 matmul inputs, f32 accum)."""
    xc = x.astype(compute_dtype)
    h1 = jnp.dot(xc, p["w1"].astype(compute_dtype).T,
                 preferred_element_type=jnp.float32) + p["b1"][:, 0]
    h1 = jnp.maximum(h1, 0.0)
    h2 = jnp.dot(h1.astype(compute_dtype), p["w2"].astype(compute_dtype).T,
                 preferred_element_type=jnp.float32) + p["b2"][:, 0]
    h2 = jnp.maximum(h2, 0.0)
    return jnp.sum(h2 * p["w3"][:, 0], axis=-1, keepdims=True) + p["b3"][0, 0]


if __name__ == "__main__":
    key = jax.random.PRNGKey(0)
    kx, kp = jax.random.split(key)

    # Small demo shapes: B=2048, block_b=1024 -> an even 2-step grid (both v7x TCs get
    # work).  Production use should rely on the default block_b=8192 (>= 1 MiB x DMA
    # per step) with B >> block_b.
    B = 2048
    TB = 1024
    x = jax.random.normal(kx, (B, config.l0), jnp.float32)
    params = init_params(kp)

    out = mlp_forward(x, params, block_b=TB)
    out = jax.block_until_ready(out)

    ref = mlp_reference(x, params)
    assert out.shape == (B, 1), out.shape
    assert jnp.allclose(out, ref, atol=2e-2, rtol=2e-2), "mismatch vs reference"

    print("KERNEL_OK")
</pallas_src>

<mosaic_0001>
module attributes {stable_mosaic.version = 11 : i64} {
  func.func @_mlp_kernel(%arg0: i32, %arg1: memref<1024x32xf32, #tpu.memory_space<vmem>>, %arg2: memref<64x32xbf16, #tpu.memory_space<vmem>>, %arg3: memref<64x1xf32, #tpu.memory_space<vmem>>, %arg4: memref<32x64xbf16, #tpu.memory_space<vmem>>, %arg5: memref<32x1xf32, #tpu.memory_space<vmem>>, %arg6: memref<32x1xf32, #tpu.memory_space<vmem>>, %arg7: memref<1x1xf32, #tpu.memory_space<smem>>, %arg8: memref<1x1024xf32, #tpu.memory_space<vmem>>) attributes {dimension_semantics = [#tpu.dimension_semantics<parallel>], iteration_bounds = array<i64: 2>, scalar_prefetch = 0 : i64, scratch_operands = 0 : i64, tpu.core_type = #tpu.core_type<tc>, window_params = [{transform_indices = @transform_0, window_bounds = array<i64: 1024, 32>}, {pipeline_mode = #tpu.pipeline_mode<synchronous>, transform_indices = @transform_1, window_bounds = array<i64: 64, 32>}, {pipeline_mode = #tpu.pipeline_mode<synchronous>, transform_indices = @transform_2, window_bounds = array<i64: 64, 1>}, {pipeline_mode = #tpu.pipeline_mode<synchronous>, transform_indices = @transform_3, window_bounds = array<i64: 32, 64>}, {pipeline_mode = #tpu.pipeline_mode<synchronous>, transform_indices = @transform_4, window_bounds = array<i64: 32, 1>}, {pipeline_mode = #tpu.pipeline_mode<synchronous>, transform_indices = @transform_5, window_bounds = array<i64: 32, 1>}, {transform_indices = @transform_6, window_bounds = array<i64: 1, 1>}, {transform_indices = @transform_7, window_bounds = array<i64: 1, 1024>}]} {
    %c0 = arith.constant 0 : index
    %c0_0 = arith.constant 0 : index
    %0 = vector.load %arg1[%c0, %c0_0] : memref<1024x32xf32, #tpu.memory_space<vmem>>, vector<1024x32xf32>
    %1 = tpu.transpose %0, [1, 0] : vector<1024x32xf32> -> vector<32x1024xf32>
    %2 = arith.truncf %1 : vector<32x1024xf32> to vector<32x1024xbf16>
    %c0_1 = arith.constant 0 : index
    %c0_2 = arith.constant 0 : index
    %3 = vector.load %arg2[%c0_1, %c0_2] : memref<64x32xbf16, #tpu.memory_space<vmem>>, vector<64x32xbf16>
    %cst = arith.constant dense<0.000000e+00> : vector<64x1024xf32>
    %4 = tpu.matmul %3, %2, %cst {dimension_numbers = #tpu.dot_dimension_numbers<[1], [0], [0], [1], [0, 0, 1, 1], [], []>} : vector<64x32xbf16>, vector<32x1024xbf16>, vector<64x1024xf32> -> vector<64x1024xf32>
    %c0_3 = arith.constant 0 : index
    %c0_4 = arith.constant 0 : index
    %5 = vector.load %arg3[%c0_3, %c0_4] : memref<64x1xf32, #tpu.memory_space<vmem>>, vector<64x1xf32>
    %6 = vector.broadcast %5 : vector<64x1xf32> to vector<64x1024xf32>
    %7 = arith.addf %4, %6 : vector<64x1024xf32>
    %cst_5 = arith.constant 0.000000e+00 : f32
    %8 = vector.broadcast %cst_5 : f32 to vector<64x1024xf32>
    %9 = arith.maximumf %7, %8 : vector<64x1024xf32>
    %c0_6 = arith.constant 0 : index
    %c0_7 = arith.constant 0 : index
    %10 = vector.load %arg4[%c0_6, %c0_7] : memref<32x64xbf16, #tpu.memory_space<vmem>>, vector<32x64xbf16>
    %11 = arith.truncf %9 : vector<64x1024xf32> to vector<64x1024xbf16>
    %cst_8 = arith.constant dense<0.000000e+00> : vector<32x1024xf32>
    %12 = tpu.matmul %10, %11, %cst_8 {dimension_numbers = #tpu.dot_dimension_numbers<[1], [0], [0], [1], [0, 0, 1, 1], [], []>} : vector<32x64xbf16>, vector<64x1024xbf16>, vector<32x1024xf32> -> vector<32x1024xf32>
    %c0_9 = arith.constant 0 : index
    %c0_10 = arith.constant 0 : index
    %13 = vector.load %arg5[%c0_9, %c0_10] : memref<32x1xf32, #tpu.memory_space<vmem>>, vector<32x1xf32>
    %14 = vector.broadcast %13 : vector<32x1xf32> to vector<32x1024xf32>
    %15 = arith.addf %12, %14 : vector<32x1024xf32>
    %cst_11 = arith.constant 0.000000e+00 : f32
    %16 = vector.broadcast %cst_11 : f32 to vector<32x1024xf32>
    %17 = arith.maximumf %15, %16 : vector<32x1024xf32>
    %c0_12 = arith.constant 0 : index
    %c0_13 = arith.constant 0 : index
    %18 = vector.load %arg6[%c0_12, %c0_13] : memref<32x1xf32, #tpu.memory_space<vmem>>, vector<32x1xf32>
    %19 = vector.broadcast %18 : vector<32x1xf32> to vector<32x1024xf32>
    %20 = arith.mulf %17, %19 : vector<32x1024xf32>
    %cst_14 = arith.constant dense<0.000000e+00> : vector<1024xf32>
    %21 = vector.multi_reduction <add>, %20, %cst_14 [0] : vector<32x1024xf32> to vector<1024xf32>
    %22 = vector.shape_cast %21 : vector<1024xf32> to vector<1x1024xf32>
    %c0_15 = arith.constant 0 : index
    %c0_16 = arith.constant 0 : index
    %23 = memref.load %arg7[%c0_15, %c0_16] : memref<1x1xf32, #tpu.memory_space<smem>>
    %24 = vector.broadcast %23 : f32 to vector<1x1024xf32>
    %25 = arith.addf %22, %24 : vector<1x1024xf32>
    %c0_17 = arith.constant 0 : index
    %c0_18 = arith.constant 0 : index
    %26 = vector.load %arg8[%c0_17, %c0_18] : memref<1x1024xf32, #tpu.memory_space<vmem>>, vector<1x1024xf32>
    tpu.vector_store %arg8[%c0_17, %c0_18], %25 {strides = array<i32>} : memref<1x1024xf32, #tpu.memory_space<vmem>>, vector<1x1024xf32>,
    return
  }
  func.func @transform_0(%arg0: i32) -> (i32, i32) {
    %c0_i32 = arith.constant 0 : i32
    %c0_i32_0 = arith.constant 0 : i32
    return %arg0, %c0_i32 : i32, i32
  }
  func.func @transform_1(%arg0: i32) -> (i32, i32) {
    %c0_i32 = arith.constant 0 : i32
    %c0_i32_0 = arith.constant 0 : i32
    %c0_i32_1 = arith.constant 0 : i32
    return %c0_i32, %c0_i32_0 : i32, i32
  }
  func.func @transform_2(%arg0: i32) -> (i32, i32) {
    %c0_i32 = arith.constant 0 : i32
    %c0_i32_0 = arith.constant 0 : i32
    %c0_i32_1 = arith.constant 0 : i32
    return %c0_i32, %c0_i32_0 : i32, i32
  }
  func.func @transform_3(%arg0: i32) -> (i32, i32) {
    %c0_i32 = arith.constant 0 : i32
    %c0_i32_0 = arith.constant 0 : i32
    %c0_i32_1 = arith.constant 0 : i32
    return %c0_i32, %c0_i32_0 : i32, i32
  }
  func.func @transform_4(%arg0: i32) -> (i32, i32) {
    %c0_i32 = arith.constant 0 : i32
    %c0_i32_0 = arith.constant 0 : i32
    %c0_i32_1 = arith.constant 0 : i32
    return %c0_i32, %c0_i32_0 : i32, i32
  }
  func.func @transform_5(%arg0: i32) -> (i32, i32) {
    %c0_i32 = arith.constant 0 : i32
    %c0_i32_0 = arith.constant 0 : i32
    %c0_i32_1 = arith.constant 0 : i32
    return %c0_i32, %c0_i32_0 : i32, i32
  }
  func.func @transform_6(%arg0: i32) -> (i32, i32) {
    %c0_i32 = arith.constant 0 : i32
    %c0_i32_0 = arith.constant 0 : i32
    %c0_i32_1 = arith.constant 0 : i32
    return %c0_i32, %c0_i32_0 : i32, i32
  }
  func.func @transform_7(%arg0: i32) -> (i32, i32) {
    %c0_i32 = arith.constant 0 : i32
    %c0_i32_0 = arith.constant 0 : i32
    return %c0_i32, %arg0 : i32, i32
  }
}

</mosaic_0001>

<bundles_post_ra>
// kernel: mlp_forward.1
= control target key start
LH: loop header
LB: loop body
LE: loop exit
PB: predicated region body
PF: predicated region fallthrough
CT: control target
= control target key end

     0   :  { %s2697_s0 = inlined_call_operand.vmem [shape: f32[2048,32], index: 0, kind: input, shape index: {}]   ;;  %s2698_s1 = inlined_call_operand.vmem [shape: bf16[64,32], index: 1, kind: input, shape index: {}]   ;;  %s2699_s2 = inlined_call_operand.vmem [shape: f32[64,1], index: 2, kind: input, shape index: {}]   ;;  %s2700_s3 = inlined_call_operand.vmem [shape: bf16[32,64], index: 3, kind: input, shape index: {}]   ;;  %s2701_s4 = inlined_call_operand.vmem [shape: f32[32,1], index: 4, kind: input, shape index: {}]   ;;  %s2702_s5 = inlined_call_operand.vmem [shape: f32[32,1], index: 5, kind: input, shape index: {}]   ;;  %s2703_s6 = inlined_call_operand.<no memory space> [shape: f32[1,1], index: 6, kind: input, shape index: {}]   ;;  %s2704_s7 = inlined_call_operand.hbm [shape: f32[1,2048], index: 7, kind: output, shape index: {}]  }
   0x1   :  { %12 = sst [smem:[#allocation2]] %s2703_s6 }
   0x2   :  { %13 = vsyncpa [#allocation4], 0 }
   0x3   :  { %15 = vsyncpa [#allocation4 + $0x1], 0  ;;  %s2129_s26 = smov 0   ;;  %s2131_s27 = smov 0  }
   0x4   :  { %s2133_s28 = smov 0   ;;  %s2135_s29 = smov 0  }
   0x5 LB: > { %s1718_s6 = sadd.s32 4294967295, %s2081_s29   ;;  %s1719_s30 = sadd.s32 4294967294, %s2081_s29   ;;  %s2081_s29 = sphi %s2135_s29, %s2710_s29   ;;  %s2077_s28 = sphi %s2133_s28, %s2709_s28   ;;  %s2073_s27 = sphi %s2131_s27, %s2708_s27   ;;  %s2069_s26 = sphi %s2129_s26, %s2707_s26  }
   0x6   : > { %s2152_s8 = sadd.s32 1, %s2081_s29   ;;  %s180_s9 = sadd.s32 1, %s2077_s28 }
   0x7   : > { %s177_s10 = ssub.s32 %s2081_s29, %s2152_s8  ;;  %p190_p0 = scmp.ne.s32.totalorder %s2077_s28, %s2073_s27 }
   0x8   : > { %p178_p1 = scmp.eq.s32.totalorder %s177_s10, 0  ;;  %p191_p2 = scmp.eq.s32.totalorder %s1718_s6, 1 }
   0x9   : > { %p196_p3 = scmp.ne.s32.totalorder %s2073_s27, %s2069_s26  ;;  %p197_p4 = scmp.eq.s32.totalorder %s1719_s30, 1 }
   0xa   : > { %s2162_s11 = scalar_select %p178_p1, %s2077_s28, %s180_s9  }
   0xb   : > { %p2164_p5 = por %p191_p2, %p190_p0  ;;  %p2168_p6 = por %p197_p4, %p196_p3 }
   0xc   : > { %p1722_p7 = scmp.ge.s32.totalorder %s2081_s29, 1  ;;  %p242_p8 = scmp.lt.s32.totalorder %s2081_s29, 3 }
   0xe   : > { %p243_p9 = pnand %p1722_p7, %p242_p8 }
   0xf   : > { %s2174_s14 = sshll.u32 (!%p243_p9), %s1718_s6, 7  ;;  %v2083_v40 = vmov (!%p243_p9), 0   ;;  %vm758_vm0 = vcmask (!%p243_p9), 261120   ;;  %vm1197_vm1 = vcmask (!%p243_p9), 523264   ;;  %s271_s20 = sand.u32 (!%p243_p9), 1, %s2073_s27  }
  0x10   : > { %246 = sbr.rel (%p243_p9) target bundleno = 763 (0x2fb), region = 48  ;;  %p275_p10 = scmp.lt.s32.totalorder (!%p243_p9), %s2174_s14, 255  ;;  %803 = vmatprep.mubr.bf16.mxu0 (!%p243_p9), %v2083_v40  ;;  %876 = vmatprep.mubr.bf16.mxu1 (!%p243_p9), %v2083_v40 }
  0x11   : > { %s1723_s21 = sshll.u32 (!%p243_p9), %s271_s20, 3  ;;  %s2655_s6 = scalar_lea.hbm (!%p243_p9), %s2704_s7, %s2174_s14 }
  0x12   : > { %s273_s22 = scalar_lea.vmem (!%p243_p9), [#allocation3], %s1723_s21  ;;  %s1646_s30 = scalar_lea.sflag (!%p243_p9), [#allocation4], %s271_s20 }
  0x13   : > { %s1660_s23 = sshll.u32 (!%p243_p9), %s273_s22, 4  ;;  %s2085_s10 = smov (!%p243_p9), [#allocation3]   ;;  %s2657_s23 = int_to_ptr.vmem [resolvable:$true] %s1660_s23 }
  0x14   : > { %s2019_s9 = scalar_lea.vmem (!%p243_p9), %s2657_s23, 128 }
  0x15   : > { %p2020_p11 = scmp.ne.s32.totalorder (!%p243_p9), %s2657_s23, %s2019_s9 }
  0x17   : > { %s276_s15 = scalar_select %p275_p10, %s2174_s14, 255 }
  0x18   : > { %p2021_p12 = pnand %p2020_p11, %p2164_p5 }
  0x19   : > { %s1725_s16 = sshll.u32 %s276_s15, 3  ;;  %s2023_s15 = sshll.u32 %s2085_s10, 4  ;;  %s2024_s15 = int_to_ptr.vmem [resolvable:$false] %s2023_s15 }
  0x1a   : > { %s2181_s19 = scalar_lea.vmem %s2697_s0, %s1725_s16  ;;  %p2022_p13 = pneg %p2021_p12 }
  0x1b   : > { %v298_v0 = vld [vmem:[%s2181_s19 + $0x80] sm:$0xff]  ;;  %v299_v5 = vld [vmem:[%s2181_s19 + $0x88] sm:$0xff]  ;;  %v300_v12 = vld [vmem:[%s2181_s19 + $0x90] sm:$0xff]  ;;  %s2025_s16 = scalar_lea.vmem %s2024_s15, 256  ;;  %p2026_p0 = scmp.lt.s32.totalorder %s2657_s23, %s2024_s15 }
  0x1c   : > { %v330_v1 = vld [vmem:[%s2181_s19 + $0x180] sm:$0xff]  ;;  %v331_v6 = vld [vmem:[%s2181_s19 + $0x188] sm:$0xff]  ;;  %v332_v13 = vld [vmem:[%s2181_s19 + $0x190] sm:$0xff]  ;;  %p2027_p1 = scmp.lt.s32.totalorder %s2025_s16, %s2019_s9 }
  0x1d   : > { %v282_v2 = vld [vmem:[%s2181_s19] sm:$0xff]  ;;  %v1803_v3 = vpack.i.bf16 %v330_v1, %v298_v0  ;;  %v283_v8 = vld [vmem:[%s2181_s19 + $0x8] sm:$0xff]  ;;  %v1805_v10 = vpack.i.bf16 %v331_v6, %v299_v5  ;;  %v284_v14 = vld [vmem:[%s2181_s19 + $0x10] sm:$0xff]  ;;  %v1807_v16 = vpack.i.bf16 %v332_v13, %v300_v12 }
  0x1e   : > { %v314_v4 = vld [vmem:[%s2181_s19 + $0x100] sm:$0xff]  ;;  %v315_v9 = vld [vmem:[%s2181_s19 + $0x108] sm:$0xff]  ;;  %v316_v15 = vld [vmem:[%s2181_s19 + $0x110] sm:$0xff]  ;;  %p2028_p2 = por %p2027_p1, %p2026_p0 }
  0x1f   : > { %v1855_v7 = vpack.i.bf16 %v314_v4, %v282_v2  ;;  %1804 = vxpose.xlu0.b32.start [1/16] (narrow) %v1803_v3, 32  ;;  %v1857_v11 = vpack.i.bf16 %v315_v9, %v283_v8  ;;  %v1859_v17 = vpack.i.bf16 %v316_v15, %v284_v14  ;;  %v301_v18 = vld [vmem:[%s2181_s19 + $0x98] sm:$0xff]  ;;  %v302_v24 = vld [vmem:[%s2181_s19 + $0xa0] sm:$0xff]  ;;  %v303_v30 = vld [vmem:[%s2181_s19 + $0xa8] sm:$0xff] }
  0x20   : > { %v333_v19 = vld [vmem:[%s2181_s19 + $0x198] sm:$0xff]  ;;  %v334_v25 = vld [vmem:[%s2181_s19 + $0x1a0] sm:$0xff]  ;;  %v335_v31 = vld [vmem:[%s2181_s19 + $0x1a8] sm:$0xff]  ;;  %p2029_p3 = pnand %p2028_p2, %p2022_p13 }
  0x21   : > { %1856 = vxpose.xlu1.b32.start [1/16] (narrow) %v1855_v7, 32  ;;  %v285_v20 = vld [vmem:[%s2181_s19 + $0x18] sm:$0xff]  ;;  %v1809_v22 = vpack.i.bf16 %v333_v19, %v301_v18  ;;  %v286_v26 = vld [vmem:[%s2181_s19 + $0x20] sm:$0xff]  ;;  %v1811_v28 = vpack.i.bf16 %v334_v25, %v302_v24  ;;  %v287_v32 = vld [vmem:[%s2181_s19 + $0x28] sm:$0xff]  ;;  %v1813_v34 = vpack.i.bf16 %v335_v31, %v303_v30 }
  0x22   : > { %v317_v21 = vld [vmem:[%s2181_s19 + $0x118] sm:$0xff]  ;;  %v318_v27 = vld [vmem:[%s2181_s19 + $0x120] sm:$0xff]  ;;  %v319_v33 = vld [vmem:[%s2181_s19 + $0x128] sm:$0xff] }
  0x23   : > { %1806 = vxpose.xlu0.b32.cont [2/16] (narrow) %v1805_v10, 32  ;;  %v1861_v23 = vpack.i.bf16 %v317_v21, %v285_v20  ;;  %v1863_v29 = vpack.i.bf16 %v318_v27, %v286_v26  ;;  %v1865_v35 = vpack.i.bf16 %v319_v33, %v287_v32  ;;  %v304_v36 = vld [vmem:[%s2181_s19 + $0xb0] sm:$0xff]  ;;  %v305_v43 = vld [vmem:[%s2181_s19 + $0xb8] sm:$0xff]  ;;  %v306_v49 = vld [vmem:[%s2181_s19 + $0xc0] sm:$0xff] }
  0x24   : > { %v336_v37 = vld [vmem:[%s2181_s19 + $0x1b0] sm:$0xff]  ;;  %v337_v44 = vld [vmem:[%s2181_s19 + $0x1b8] sm:$0xff]  ;;  %v338_v50 = vld [vmem:[%s2181_s19 + $0x1c0] sm:$0xff] }
  0x25   : > { %1858 = vxpose.xlu1.b32.cont [2/16] (narrow) %v1857_v11, 32  ;;  %v288_v38 = vld [vmem:[%s2181_s19 + $0x30] sm:$0xff]  ;;  %v1815_v41 = vpack.i.bf16 %v336_v37, %v304_v36  ;;  %v289_v45 = vld [vmem:[%s2181_s19 + $0x38] sm:$0xff]  ;;  %v1817_v47 = vpack.i.bf16 %v337_v44, %v305_v43  ;;  %v290_v51 = vld [vmem:[%s2181_s19 + $0x40] sm:$0xff]  ;;  %v1819_v53 = vpack.i.bf16 %v338_v50, %v306_v49 }
  0x26   : > { %v320_v39 = vld [vmem:[%s2181_s19 + $0x130] sm:$0xff]  ;;  %v321_v46 = vld [vmem:[%s2181_s19 + $0x138] sm:$0xff]  ;;  %v322_v52 = vld [vmem:[%s2181_s19 + $0x140] sm:$0xff] }
  0x27   : > { %1808 = vxpose.xlu0.b32.cont [3/16] (narrow) %v1807_v16, 32  ;;  %v1867_v42 = vpack.i.bf16 %v320_v39, %v288_v38  ;;  %v1869_v48 = vpack.i.bf16 %v321_v46, %v289_v45  ;;  %v1871_v54 = vpack.i.bf16 %v322_v52, %v290_v51  ;;  %v307_v55 = vld [vmem:[%s2181_s19 + $0xc8] sm:$0xff]  ;;  %v308_v61 = vld [vmem:[%s2181_s19 + $0xd0] sm:$0xff]  ;;  %v309_v3 = vld [vmem:[%s2181_s19 + $0xd8] sm:$0xff] }
  0x28   : > { %v339_v56 = vld [vmem:[%s2181_s19 + $0x1c8] sm:$0xff]  ;;  %v340_v62 = vld [vmem:[%s2181_s19 + $0x1d0] sm:$0xff]  ;;  %v341_v4 = vld [vmem:[%s2181_s19 + $0x1d8] sm:$0xff] }
  0x29   : > { %1860 = vxpose.xlu1.b32.cont [3/16] (narrow) %v1859_v17, 32  ;;  %v291_v57 = vld [vmem:[%s2181_s19 + $0x48] sm:$0xff]  ;;  %v1821_v59 = vpack.i.bf16 %v339_v56, %v307_v55  ;;  %v292_v63 = vld [vmem:[%s2181_s19 + $0x50] sm:$0xff]  ;;  %v1823_v1 = vpack.i.bf16 %v340_v62, %v308_v61  ;;  %v293_v5 = vld [vmem:[%s2181_s19 + $0x58] sm:$0xff]  ;;  %v1825_v7 = vpack.i.bf16 %v341_v4, %v309_v3 }
  0x2a   : > { %v323_v58 = vld [vmem:[%s2181_s19 + $0x148] sm:$0xff]  ;;  %v324_v0 = vld [vmem:[%s2181_s19 + $0x150] sm:$0xff]  ;;  %v325_v6 = vld [vmem:[%s2181_s19 + $0x158] sm:$0xff] }
  0x2b   : > { %1810 = vxpose.xlu0.b32.cont [4/16] (narrow) %v1809_v22, 32  ;;  %v1873_v60 = vpack.i.bf16 %v323_v58, %v291_v57  ;;  %v1875_v2 = vpack.i.bf16 %v324_v0, %v292_v63  ;;  %v1877_v8 = vpack.i.bf16 %v325_v6, %v293_v5  ;;  %v310_v9 = vld [vmem:[%s2181_s19 + $0xe0] sm:$0xff]  ;;  %v311_v15 = vld [vmem:[%s2181_s19 + $0xe8] sm:$0xff]  ;;  %v312_v21 = vld [vmem:[%s2181_s19 + $0xf0] sm:$0xff] }
  0x2c   : > { %v342_v10 = vld [vmem:[%s2181_s19 + $0x1e0] sm:$0xff]  ;;  %v343_v16 = vld [vmem:[%s2181_s19 + $0x1e8] sm:$0xff]  ;;  %v344_v22 = vld [vmem:[%s2181_s19 + $0x1f0] sm:$0xff] }
  0x2d   : > { %1862 = vxpose.xlu1.b32.cont [4/16] (narrow) %v1861_v23, 32  ;;  %v294_v11 = vld [vmem:[%s2181_s19 + $0x60] sm:$0xff]  ;;  %v1827_v13 = vpack.i.bf16 %v342_v10, %v310_v9  ;;  %v295_v17 = vld [vmem:[%s2181_s19 + $0x68] sm:$0xff]  ;;  %v1829_v19 = vpack.i.bf16 %v343_v16, %v311_v15  ;;  %v296_v23 = vld [vmem:[%s2181_s19 + $0x70] sm:$0xff]  ;;  %v1831_v25 = vpack.i.bf16 %v344_v22, %v312_v21 }
  0x2e   : > { %v326_v12 = vld [vmem:[%s2181_s19 + $0x160] sm:$0xff]  ;;  %v327_v18 = vld [vmem:[%s2181_s19 + $0x168] sm:$0xff]  ;;  %v328_v24 = vld [vmem:[%s2181_s19 + $0x170] sm:$0xff] }
  0x2f   : > { %1812 = vxpose.xlu0.b32.cont [5/16] (narrow) %v1811_v28, 32  ;;  %v1879_v14 = vpack.i.bf16 %v326_v12, %v294_v11  ;;  %v1881_v20 = vpack.i.bf16 %v327_v18, %v295_v17  ;;  %v1883_v26 = vpack.i.bf16 %v328_v24, %v296_v23  ;;  %v313_v27 = vld [vmem:[%s2181_s19 + $0xf8] sm:$0xff]  ;;  %v362_v33 = vld [vmem:[%s2181_s19 + $0x280] sm:$0xff]  ;;  %v363_v39 = vld [vmem:[%s2181_s19 + $0x288] sm:$0xff] }
  0x30   : > { %v345_v28 = vld [vmem:[%s2181_s19 + $0x1f8] sm:$0xff]  ;;  %v378_v36 = vld [vmem:[%s2181_s19 + $0x300] sm:$0xff]  ;;  %v379_v43 = vld [vmem:[%s2181_s19 + $0x308] sm:$0xff] }
  0x31   : > { %1864 = vxpose.xlu1.b32.cont [5/16] (narrow) %v1863_v29, 32  ;;  %v297_v29 = vld [vmem:[%s2181_s19 + $0x78] sm:$0xff]  ;;  %v1833_v31 = vpack.i.bf16 %v345_v28, %v313_v27  ;;  %v364_v46 = vld [vmem:[%s2181_s19 + $0x290] sm:$0xff]  ;;  %v366_v58 = vld [vmem:[%s2181_s19 + $0x2a0] sm:$0xff] }
  0x32   : > { %v329_v30 = vld [vmem:[%s2181_s19 + $0x178] sm:$0xff]  ;;  %v380_v49 = vld [vmem:[%s2181_s19 + $0x310] sm:$0xff]  ;;  %v382_v61 = vld [vmem:[%s2181_s19 + $0x320] sm:$0xff] }
  0x33   : > { %1814 = vxpose.xlu0.b32.cont [6/16] (narrow) %v1813_v34, 32  ;;  %v1885_v32 = vpack.i.bf16 %v329_v30, %v297_v29  ;;  %v394_v34 = vld [vmem:[%s2181_s19 + $0x380] sm:$0xff]  ;;  %v365_v52 = vld [vmem:[%s2181_s19 + $0x298] sm:$0xff]  ;;  %v367_v0 = vld [vmem:[%s2181_s19 + $0x2a8] sm:$0xff] }
  0x34   : > { %v1907_v37 = vpack.i.bf16 %v394_v34, %v362_v33  ;;  %v381_v55 = vld [vmem:[%s2181_s19 + $0x318] sm:$0xff]  ;;  %v383_v3 = vld [vmem:[%s2181_s19 + $0x328] sm:$0xff]  ;;  %v368_v6 = vld [vmem:[%s2181_s19 + $0x2b0] sm:$0xff] }
  0x35   : > { %1866 = vxpose.xlu1.b32.cont [6/16] (narrow) %v1865_v35, 32  ;;  %v346_v35 = vld [vmem:[%s2181_s19 + $0x200] sm:$0xff]  ;;  %v384_v9 = vld [vmem:[%s2181_s19 + $0x330] sm:$0xff]  ;;  %v369_v12 = vld [vmem:[%s2181_s19 + $0x2b8] sm:$0xff] }
  0x36   : > { %v1959_v38 = vpack.i.bf16 %v378_v36, %v346_v35  ;;  %v385_v15 = vld [vmem:[%s2181_s19 + $0x338] sm:$0xff]  ;;  %v370_v18 = vld [vmem:[%s2181_s19 + $0x2c0] sm:$0xff]  ;;  %v371_v24 = vld [vmem:[%s2181_s19 + $0x2c8] sm:$0xff] }
  0x37   : > { %1816 = vxpose.xlu0.b32.cont [7/16] (narrow) %v1815_v41, 32  ;;  %v395_v41 = vld [vmem:[%s2181_s19 + $0x388] sm:$0xff]  ;;  %v386_v21 = vld [vmem:[%s2181_s19 + $0x340] sm:$0xff]  ;;  %v372_v30 = vld [vmem:[%s2181_s19 + $0x2d0] sm:$0xff] }
  0x38   : > { %v1909_v44 = vpack.i.bf16 %v395_v41, %v363_v39  ;;  %v387_v27 = vld [vmem:[%s2181_s19 + $0x348] sm:$0xff]  ;;  %v388_v33 = vld [vmem:[%s2181_s19 + $0x350] sm:$0xff]  ;;  %v373_v36 = vld [vmem:[%s2181_s19 + $0x2d8] sm:$0xff] }
  0x39   : > { %1868 = vxpose.xlu1.b32.cont [7/16] (narrow) %v1867_v42, 32  ;;  %v347_v42 = vld [vmem:[%s2181_s19 + $0x208] sm:$0xff]  ;;  %v389_v39 = vld [vmem:[%s2181_s19 + $0x358] sm:$0xff] }
  0x3a   : > { %v1961_v45 = vpack.i.bf16 %v379_v43, %v347_v42  ;;  %v374_v43 = vld [vmem:[%s2181_s19 + $0x2e0] sm:$0xff] }
  0x3b   : > { %1818 = vxpose.xlu0.b32.cont [8/16] (narrow) %v1817_v47, 32  ;;  %v396_v47 = vld [vmem:[%s2181_s19 + $0x390] sm:$0xff] }
  0x3c   : > { %v1911_v50 = vpack.i.bf16 %v396_v47, %v364_v46  ;;  %v390_v46 = vld [vmem:[%s2181_s19 + $0x360] sm:$0xff] }
  0x3d   : > { %1870 = vxpose.xlu1.b32.cont [8/16] (narrow) %v1869_v48, 32  ;;  %v348_v48 = vld [vmem:[%s2181_s19 + $0x210] sm:$0xff] }
  0x3e   : > { %v1963_v51 = vpack.i.bf16 %v380_v49, %v348_v48  ;;  %v375_v49 = vld [vmem:[%s2181_s19 + $0x2e8] sm:$0xff] }
  0x3f   : > { %1820 = vxpose.xlu0.b32.cont [9/16] (narrow) %v1819_v53, 32  ;;  %v397_v53 = vld [vmem:[%s2181_s19 + $0x398] sm:$0xff] }
  0x40   : > { %v1913_v56 = vpack.i.bf16 %v397_v53, %v365_v52  ;;  %v391_v52 = vld [vmem:[%s2181_s19 + $0x368] sm:$0xff] }
  0x41   : > { %1872 = vxpose.xlu1.b32.cont [9/16] (narrow) %v1871_v54, 32  ;;  %v349_v54 = vld [vmem:[%s2181_s19 + $0x218] sm:$0xff] }
  0x42   : > { %v1965_v57 = vpack.i.bf16 %v381_v55, %v349_v54  ;;  %v376_v55 = vld [vmem:[%s2181_s19 + $0x2f0] sm:$0xff] }
  0x43   : > { %1822 = vxpose.xlu0.b32.cont [10/16] (narrow) %v1821_v59, 32  ;;  %v398_v59 = vld [vmem:[%s2181_s19 + $0x3a0] sm:$0xff] }
  0x44   : > { %v1915_v62 = vpack.i.bf16 %v398_v59, %v366_v58  ;;  %v392_v58 = vld [vmem:[%s2181_s19 + $0x370] sm:$0xff] }
  0x45   : > { %1874 = vxpose.xlu1.b32.cont [10/16] (narrow) %v1873_v60, 32  ;;  %v350_v60 = vld [vmem:[%s2181_s19 + $0x220] sm:$0xff] }
  0x46   : > { %v1967_v63 = vpack.i.bf16 %v382_v61, %v350_v60  ;;  %v377_v61 = vld [vmem:[%s2181_s19 + $0x2f8] sm:$0xff] }
  0x47   : > { %1824 = vxpose.xlu0.b32.cont [11/16] (narrow) %v1823_v1, 32  ;;  %v399_v1 = vld [vmem:[%s2181_s19 + $0x3a8] sm:$0xff] }
  0x48   : > { %v1917_v4 = vpack.i.bf16 %v399_v1, %v367_v0  ;;  %v393_v0 = vld [vmem:[%s2181_s19 + $0x378] sm:$0xff] }
  0x49   : > { %1876 = vxpose.xlu1.b32.cont [11/16] (narrow) %v1875_v2, 32  ;;  %v351_v2 = vld [vmem:[%s2181_s19 + $0x228] sm:$0xff] }
  0x4a   : > { %v1969_v5 = vpack.i.bf16 %v383_v3, %v351_v2 }
  0x4b   : > { %1826 = vxpose.xlu0.b32.cont [12/16] (narrow) %v1825_v7, 32  ;;  %v400_v7 = vld [vmem:[%s2181_s19 + $0x3b0] sm:$0xff] }
  0x4c   : > { %v1919_v10 = vpack.i.bf16 %v400_v7, %v368_v6 }
  0x4d   : > { %1878 = vxpose.xlu1.b32.cont [12/16] (narrow) %v1877_v8, 32  ;;  %v352_v8 = vld [vmem:[%s2181_s19 + $0x230] sm:$0xff] }
  0x4e   : > { %v1971_v11 = vpack.i.bf16 %v384_v9, %v352_v8 }
  0x4f   : > { %1828 = vxpose.xlu0.b32.cont [13/16] (narrow) %v1827_v13, 32  ;;  %v401_v13 = vld [vmem:[%s2181_s19 + $0x3b8] sm:$0xff] }
  0x50   : > { %v1921_v16 = vpack.i.bf16 %v401_v13, %v369_v12 }
  0x51   : > { %1880 = vxpose.xlu1.b32.cont [13/16] (narrow) %v1879_v14, 32  ;;  %v353_v14 = vld [vmem:[%s2181_s19 + $0x238] sm:$0xff] }
  0x52   : > { %v1973_v17 = vpack.i.bf16 %v385_v15, %v353_v14 }
  0x53   : > { %1830 = vxpose.xlu0.b32.cont [14/16] (narrow) %v1829_v19, 32  ;;  %v402_v19 = vld [vmem:[%s2181_s19 + $0x3c0] sm:$0xff] }
  0x54   : > { %v1923_v22 = vpack.i.bf16 %v402_v19, %v370_v18 }
  0x55   : > { %1882 = vxpose.xlu1.b32.cont [14/16] (narrow) %v1881_v20, 32  ;;  %v354_v20 = vld [vmem:[%s2181_s19 + $0x240] sm:$0xff] }
  0x56   : > { %v1975_v23 = vpack.i.bf16 %v386_v21, %v354_v20 }
  0x57   : > { %1832 = vxpose.xlu0.b32.cont [15/16] (narrow) %v1831_v25, 32  ;;  %v403_v25 = vld [vmem:[%s2181_s19 + $0x3c8] sm:$0xff] }
  0x58   : > { %v1925_v28 = vpack.i.bf16 %v403_v25, %v371_v24 }
  0x59   : > { %1884 = vxpose.xlu1.b32.cont [15/16] (narrow) %v1883_v26, 32  ;;  %v355_v26 = vld [vmem:[%s2181_s19 + $0x248] sm:$0xff] }
  0x5a   : > { %v1977_v29 = vpack.i.bf16 %v387_v27, %v355_v26 }
  0x5b   : > { %1834 = vxpose.xlu0.b32.end [16/16] (narrow) %v1833_v31, 32  ;;  %v404_v31 = vld [vmem:[%s2181_s19 + $0x3d0] sm:$0xff] }
  0x5c   : > { %v1927_v34 = vpack.i.bf16 %v404_v31, %v372_v30 }
  0x5d   : > { %1886 = vxpose.xlu1.b32.end [16/16] (narrow) %v1885_v32, 32  ;;  %v356_v32 = vld [vmem:[%s2181_s19 + $0x250] sm:$0xff] }
  0x5e   : > { %v1979_v35 = vpack.i.bf16 %v388_v33, %v356_v32 }
  0x5f   : > { %1908 = vxpose.xlu0.b32.start [1/16] (narrow) %v1907_v37, 32  ;;  %v405_v37 = vld [vmem:[%s2181_s19 + $0x3d8] sm:$0xff] }
  0x60   : > { %v1929_v41 = vpack.i.bf16 %v405_v37, %v373_v36  ;;  %v2327_v36 = vld [vmem:[%s2698_s1 + $0x8] sm:$0xff]  }
  0x61   : > { %1960 = vxpose.xlu1.b32.start [1/16] (narrow) %v1959_v38, 32  ;;  %v357_v38 = vld [vmem:[%s2181_s19 + $0x258] sm:$0xff]  ;;  %v691_v37 = vld [vmem:[%s2699_s2 + $0x8] sm:$0xff] }
  0x62   : > { %v1981_v42 = vpack.i.bf16 %v389_v39, %v357_v38  ;;  %v692_v38 = vld [vmem:[%s2699_s2 + $0x10] sm:$0xff] }
  0x63   : > { %1910 = vxpose.xlu0.b32.cont [2/16] (narrow) %v1909_v44, 32  ;;  %v406_v44 = vld [vmem:[%s2181_s19 + $0x3e0] sm:$0xff]  ;;  %v2345_v39 = vld [vmem:[%s2698_s1 + $0x10] sm:$0xff]  }
  0x64   : > { %v1931_v47 = vpack.i.bf16 %v406_v44, %v374_v43  ;;  %v694_v43 = vld [vmem:[%s2699_s2 + $0x20] sm:$0xff]  ;;  %v2366_v44 = vld [vmem:[%s2698_s1 + $0x18] sm:$0xff]  }
  0x65   : > { %1962 = vxpose.xlu1.b32.cont [2/16] (narrow) %v1961_v45, 32  ;;  %v358_v45 = vld [vmem:[%s2181_s19 + $0x260] sm:$0xff] }
  0x66   : > { %v1983_v48 = vpack.i.bf16 %v390_v46, %v358_v45  ;;  %v695_v45 = vld [vmem:[%s2699_s2 + $0x28] sm:$0xff]  ;;  %v696_v46 = vld [vmem:[%s2699_s2 + $0x30] sm:$0xff] }
  0x67   : > { %1912 = vxpose.xlu0.b32.cont [3/16] (narrow) %v1911_v50, 32  ;;  %v407_v50 = vld [vmem:[%s2181_s19 + $0x3e8] sm:$0xff] }
  0x68   : > { %v1933_v53 = vpack.i.bf16 %v407_v50, %v375_v49  ;;  %v1164_v49 = vld [vmem:[%s2701_s4 + $0x8] sm:$0xff]  ;;  %v1165_v50 = vld [vmem:[%s2701_s4 + $0x10] sm:$0xff] }
  0x69   : > { %1964 = vxpose.xlu1.b32.cont [3/16] (narrow) %v1963_v51, 32  ;;  %v359_v51 = vld [vmem:[%s2181_s19 + $0x268] sm:$0xff] }
  0x6a   : > { %v1985_v54 = vpack.i.bf16 %v391_v52, %v359_v51  ;;  %v1166_v51 = vld [vmem:[%s2701_s4 + $0x18] sm:$0xff]  ;;  %v1448_v52 = vld [vmem:[%s2702_s5] sm:$0xff] }
  0x6b   : > { %1914 = vxpose.xlu0.b32.cont [4/16] (narrow) %v1913_v56, 32  ;;  %v408_v56 = vld [vmem:[%s2181_s19 + $0x3f0] sm:$0xff] }
  0x6c   : > { %v1935_v59 = vpack.i.bf16 %v408_v56, %v376_v55  ;;  %v1451_v55 = vld [vmem:[%s2702_s5 + $0x18] sm:$0xff] }
  0x6d   : > { %1966 = vxpose.xlu1.b32.cont [4/16] (narrow) %v1965_v57, 32  ;;  %v360_v57 = vld [vmem:[%s2181_s19 + $0x270] sm:$0xff] }
  0x6e   : > { %v1987_v60 = vpack.i.bf16 %v392_v58, %v360_v57 }
  0x6f   : > { %1916 = vxpose.xlu0.b32.cont [5/16] (narrow) %v1915_v62, 32  ;;  %v409_v62 = vld [vmem:[%s2181_s19 + $0x3f8] sm:$0xff] }
  0x70   : > { %v1937_v1 = vpack.i.bf16 %v409_v62, %v377_v61 }
  0x71   : > { %1968 = vxpose.xlu1.b32.cont [5/16] (narrow) %v1967_v63, 32  ;;  %v361_v63 = vld [vmem:[%s2181_s19 + $0x278] sm:$0xff]  ;;  %s1576_s19 = sld [smem:[#allocation2]] }
  0x72   : > { %v1989_v2 = vpack.i.bf16 %v393_v0, %v361_v63 }
  0x73   : > { %1918 = vxpose.xlu0.b32.cont [6/16] (narrow) %v1917_v4, 32 }
  0x75   : > { %1970 = vxpose.xlu1.b32.cont [6/16] (narrow) %v1969_v5, 32 }
  0x77   : > { %1920 = vxpose.xlu0.b32.cont [7/16] (narrow) %v1919_v10, 32 }
  0x79   : > { %1972 = vxpose.xlu1.b32.cont [7/16] (narrow) %v1971_v11, 32 }
  0x7b   : > { %1922 = vxpose.xlu0.b32.cont [8/16] (narrow) %v1921_v16, 32 }
  0x7d   : > { %1974 = vxpose.xlu1.b32.cont [8/16] (narrow) %v1973_v17, 32 }
  0x7f   : > { %1924 = vxpose.xlu0.b32.cont [9/16] (narrow) %v1923_v22, 32 }
  0x81   : > { %1976 = vxpose.xlu1.b32.cont [9/16] (narrow) %v1975_v23, 32 }
  0x83   : > { %1926 = vxpose.xlu0.b32.cont [10/16] (narrow) %v1925_v28, 32 }
  0x85   : > { %1978 = vxpose.xlu1.b32.cont [10/16] (narrow) %v1977_v29, 32 }
  0x87   : > { %1928 = vxpose.xlu0.b32.cont [11/16] (narrow) %v1927_v34, 32 }
  0x89   : > { %1980 = vxpose.xlu1.b32.cont [11/16] (narrow) %v1979_v35, 32  ;;  %v2316_v35 = vld [vmem:[%s2698_s1] sm:$0xff]  }
  0x8b   : > { %1930 = vxpose.xlu0.b32.cont [12/16] (narrow) %v1929_v41, 32  ;;  %v693_v41 = vld [vmem:[%s2699_s2 + $0x18] sm:$0xff] }
  0x8d   : > { %1982 = vxpose.xlu1.b32.cont [12/16] (narrow) %v1981_v42, 32  ;;  %v690_v42 = vld [vmem:[%s2699_s2] sm:$0xff] }
  0x8f   : > { %1932 = vxpose.xlu0.b32.cont [13/16] (narrow) %v1931_v47, 32  ;;  %v697_v47 = vld [vmem:[%s2699_s2 + $0x38] sm:$0xff] }
  0x91   : > { %1984 = vxpose.xlu1.b32.cont [13/16] (narrow) %v1983_v48, 32  ;;  %v1163_v48 = vld [vmem:[%s2701_s4] sm:$0xff] }
  0x93   : > { %1934 = vxpose.xlu0.b32.cont [14/16] (narrow) %v1933_v53, 32  ;;  %v1449_v53 = vld [vmem:[%s2702_s5 + $0x8] sm:$0xff] }
  0x95   : > { %1986 = vxpose.xlu1.b32.cont [14/16] (narrow) %v1985_v54, 32  ;;  %v1450_v54 = vld [vmem:[%s2702_s5 + $0x10] sm:$0xff] }
  0x97   : > { %1936 = vxpose.xlu0.b32.cont [15/16] (narrow) %v1935_v59, 32 }
  0x99   : > { %1988 = vxpose.xlu1.b32.cont [15/16] (narrow) %v1987_v60, 32 }
  0x9b   : > { %1938 = vxpose.xlu0.b32.end [16/16] (narrow) %v1937_v1, 32 }
  0x9d   : > { %1990 = vxpose.xlu1.b32.end [16/16] (narrow) %v1989_v2, 32 }
  0x9f   : > { %v1835_v3 = vpop.trf.xlu0 }
  0xa0   : > { %v1836_v5 = vunpack.i.l.bf16 %v1835_v3  ;;  %v1839_v6 = vunpack.i.h.bf16 %v1835_v3 }
  0xa1   : > { %v1887_v4 = vpop.trf.xlu1 }
  0xa2   : > { %v1888_v8 = vunpack.i.l.bf16 %v1887_v4  ;;  %v1891_v9 = vunpack.i.h.bf16 %v1887_v4 }
  0xa3   : > { %v1840_v7 = vpop.trf.xlu0 }
  0xa4   : > { %v1841_v11 = vunpack.i.l.bf16 %v1840_v7  ;;  %v1844_v12 = vunpack.i.h.bf16 %v1840_v7 }
  0xa5   : > { %v1892_v10 = vpop.trf.xlu1 }
  0xa6   : > { %v1893_v13 = vunpack.i.l.bf16 %v1892_v10  ;;  %v1896_v14 = vunpack.i.h.bf16 %v1892_v10  ;;  %v667_v15 = vpack.c.bf16 %v1841_v11, %v1836_v5  ;;  %v669_v16 = vpack.c.bf16 %v1844_v12, %v1839_v6 }
  0xa7   : > { %v1845_v17 = vpop.trf.xlu0 }
  0xa8   : > { %v666_v18 = vpack.c.bf16 %v1893_v13, %v1888_v8  ;;  %v668_v19 = vpack.c.bf16 %v1896_v14, %v1891_v9  ;;  %771 = vmatprep.subr.bf16.mxu0 %v667_v15  ;;  %844 = vmatprep.subr.bf16.mxu1 %v669_v16  ;;  %v1849_v21 = vunpack.i.h.bf16 %v1845_v17  ;;  %v1846_v22 = vunpack.i.l.bf16 %v1845_v17 }
  0xa9   : > { %v1897_v20 = vpop.trf.xlu1 }
  0xaa   : > { %772 = vmatpush1.bf16.msra.mxu0 %v666_v18  ;;  %845 = vmatpush1.bf16.msra.mxu1 %v668_v19  ;;  %v1901_v23 = vunpack.i.h.bf16 %v1897_v20  ;;  %v1898_v24 = vunpack.i.l.bf16 %v1897_v20 }
  0xab   : > { %v1850_v25 = vpop.trf.xlu0 }
  0xac   : > { %v1854_v26 = vunpack.i.h.bf16 %v1850_v25  ;;  %v1851_v27 = vunpack.i.l.bf16 %v1850_v25 }
  0xad   : > { %v1902_v28 = vpop.trf.xlu1 }
  0xae   : > { %v1906_v29 = vunpack.i.h.bf16 %v1902_v28  ;;  %v1903_v30 = vunpack.i.l.bf16 %v1902_v28  ;;  %v675_v31 = vpack.c.bf16 %v1851_v27, %v1846_v22  ;;  %v677_v32 = vpack.c.bf16 %v1854_v26, %v1849_v21 }
  0xb0   : > { %v674_v33 = vpack.c.bf16 %v1903_v30, %v1898_v24  ;;  %v676_v34 = vpack.c.bf16 %v1906_v29, %v1901_v23  ;;  %773 = vmatprep.subr.bf16.mxu0 %v675_v31  ;;  %846 = vmatprep.subr.bf16.mxu1 %v677_v32 }
  0xb2   : > { %774 = vmatpush1.bf16.msra.mxu0 %v674_v33  ;;  %847 = vmatpush1.bf16.msra.mxu1 %v676_v34 }
  0xb5   : > { %1730 = vmatmul.mubr.msk.bf16.vlgmr.msra.gmra.mrb[0].mxu0 %vm758_vm0, %v2316_v35  ;;  %1734 = vmatmul.mubr.msk.bf16.vlgmr.msra.gmra.mrb[0].mxu1 %vm758_vm0, %v2316_v35 }
  0xb6   : > { %813 = vmatprep.mubr.bf16.mxu0 %v2083_v40  ;;  %886 = vmatprep.mubr.bf16.mxu1 %v2083_v40 }
  0xbb   : > { %2012 = vset.pattern.permute.xlu1 %v2083_v40 }
  0xbc   : > { %705 = vperm.xlu1 %2012, %v691_v37  }
  0xbd   : > { %1731 = vmatmul.mubr.msk.bf16.gmra.mrb[4].mxu0 %vm758_vm0, %v2327_v36  ;;  %1735 = vmatmul.mubr.msk.bf16.gmra.mrb[4].mxu1 %vm758_vm0, %v2327_v36 }
  0xbe   : > { %823 = vmatprep.mubr.bf16.mxu0 %v2083_v40  ;;  %896 = vmatprep.mubr.bf16.mxu1 %v2083_v40 }
  0xc0   : > { %710 = vperm.xlu1 %2012, %v692_v38  }
  0xc4   : > { %715 = vperm.xlu1 %2012, %v693_v41   ;;  %2011 = vset.pattern.permute.xlu0 %v2083_v40 }
  0xc5   : > { %1732 = vmatmul.mubr.msk.bf16.gmra.mrb[8].mxu0 %vm758_vm0, %v2345_v39  ;;  %1736 = vmatmul.mubr.msk.bf16.gmra.mrb[8].mxu1 %vm758_vm0, %v2345_v39 }
  0xc6   : > { %833 = vmatprep.mubr.bf16.mxu0 %v2083_v40  ;;  %906 = vmatprep.mubr.bf16.mxu1 %v2083_v40 }
  0xc7   : > { %700 = vperm.xlu0 %2011, %v690_v42  }
  0xc8   : > { %720 = vperm.xlu1 %2012, %v694_v43  }
  0xcb   : > { %725 = vperm.xlu0 %2011, %v695_v45  }
  0xcc   : > { %730 = vperm.xlu1 %2012, %v696_v46  }
  0xcd   : > { %1733 = vmatmul.mubr.msk.bf16.gmra.mrb[12].mxu0 %vm758_vm0, %v2366_v44  ;;  %1737 = vmatmul.mubr.msk.bf16.gmra.mrb[12].mxu1 %vm758_vm0, %v2366_v44 }
  0xce   : > { %949 = vmatprep.mubr.bf16.mxu0 %v2083_v40  ;;  %1022 = vmatprep.mubr.bf16.mxu1 %v2083_v40 }
  0xcf   : > { %735 = vperm.xlu0 %2011, %v697_v47  }
  0xd0   : > { %1169 = vperm.xlu1 %2012, %v1163_v48  }
  0xd3   : > { %1174 = vperm.xlu0 %2011, %v1164_v49  }
  0xd4   : > { %1179 = vperm.xlu1 %2012, %v1165_v50  }
  0xd7   : > { %1184 = vperm.xlu0 %2011, %v1166_v51  }
  0xd8   : > { %1454 = vperm.xlu1 %2012, %v1448_v52  }
  0xdb   : > { %1459 = vperm.xlu0 %2011, %v1449_v53  }
  0xdc   : > { %1464 = vperm.xlu1 %2012, %v1450_v54  }
  0xdf   : > { %v1939_v56 = vpop.trf.xlu0  ;;  %1469 = vperm.xlu0 %2011, %v1451_v55  }
  0xe0   : > { %v1943_v58 = vunpack.i.h.bf16 %v1939_v56  ;;  %v1940_v59 = vunpack.i.l.bf16 %v1939_v56 }
  0xe1   : > { %v1991_v57 = vpop.trf.xlu1 }
  0xe2   : > { %v1995_v60 = vunpack.i.h.bf16 %v1991_v57  ;;  %v1992_v61 = vunpack.i.l.bf16 %v1991_v57 }
  0xe3   : > { %v1944_v62 = vpop.trf.xlu0 }
  0xe4   : > { %v1948_v63 = vunpack.i.h.bf16 %v1944_v62  ;;  %v1945_v0 = vunpack.i.l.bf16 %v1944_v62 }
  0xe5   : > { %v1996_v1 = vpop.trf.xlu1 }
  0xe6   : > { %v2000_v2 = vunpack.i.h.bf16 %v1996_v1  ;;  %v1997_v3 = vunpack.i.l.bf16 %v1996_v1  ;;  %v671_v4 = vpack.c.bf16 %v1945_v0, %v1940_v59  ;;  %v673_v5 = vpack.c.bf16 %v1948_v63, %v1943_v58 }
  0xe7   : > { %v1949_v6 = vpop.trf.xlu0 }
  0xe8   : > { %v670_v7 = vpack.c.bf16 %v1997_v3, %v1992_v61  ;;  %v672_v8 = vpack.c.bf16 %v2000_v2, %v1995_v60  ;;  %917 = vmatprep.subr.bf16.mxu0 %v671_v4  ;;  %990 = vmatprep.subr.bf16.mxu1 %v673_v5  ;;  %v1953_v10 = vunpack.i.h.bf16 %v1949_v6  ;;  %v1950_v11 = vunpack.i.l.bf16 %v1949_v6 }
  0xe9   : > { %v2001_v9 = vpop.trf.xlu1 }
  0xea   : > { %918 = vmatpush1.bf16.msra.mxu0 %v670_v7  ;;  %991 = vmatpush1.bf16.msra.mxu1 %v672_v8  ;;  %v2005_v12 = vunpack.i.h.bf16 %v2001_v9  ;;  %v2002_v13 = vunpack.i.l.bf16 %v2001_v9 }
  0xeb   : > { %v1954_v14 = vpop.trf.xlu0 }
  0xec   : > { %v1958_v15 = vunpack.i.h.bf16 %v1954_v14  ;;  %v1955_v16 = vunpack.i.l.bf16 %v1954_v14 }
  0xed   : > { %v2006_v17 = vpop.trf.xlu1 }
  0xee   : > { %v2010_v18 = vunpack.i.h.bf16 %v2006_v17  ;;  %v2007_v19 = vunpack.i.l.bf16 %v2006_v17  ;;  %v679_v20 = vpack.c.bf16 %v1955_v16, %v1950_v11  ;;  %v681_v21 = vpack.c.bf16 %v1958_v15, %v1953_v10 }
  0xf0   : > { %v678_v22 = vpack.c.bf16 %v2007_v19, %v2002_v13  ;;  %v680_v23 = vpack.c.bf16 %v2010_v18, %v2005_v12  ;;  %919 = vmatprep.subr.bf16.mxu0 %v679_v20  ;;  %992 = vmatprep.subr.bf16.mxu1 %v681_v21 }
  0xf2   : > { %920 = vmatpush1.bf16.msra.mxu0 %v678_v22  ;;  %993 = vmatpush1.bf16.msra.mxu1 %v680_v23 }
  0xf5   : > { %1738 = vmatmul.mubr.msk.bf16.vlgmr.msra.gmra.mrb[16].mxu0 %vm758_vm0, %v2316_v35  ;;  %1742 = vmatmul.mubr.msk.bf16.vlgmr.msra.gmra.mrb[16].mxu1 %vm758_vm0, %v2316_v35 }
  0xf6   : > { %959 = vmatprep.mubr.bf16.mxu0 %v2083_v40  ;;  %1032 = vmatprep.mubr.bf16.mxu1 %v2083_v40 }
  0xfd   : > { %1739 = vmatmul.mubr.msk.bf16.gmra.mrb[20].mxu0 %vm758_vm0, %v2327_v36  ;;  %1743 = vmatmul.mubr.msk.bf16.gmra.mrb[20].mxu1 %vm758_vm0, %v2327_v36 }
  0xfe   : > { %969 = vmatprep.mubr.bf16.mxu0 %v2083_v40  ;;  %1042 = vmatprep.mubr.bf16.mxu1 %v2083_v40 }
 0x105   : > { %1740 = vmatmul.mubr.msk.bf16.gmra.mrb[24].mxu0 %vm758_vm0, %v2345_v39  ;;  %1744 = vmatmul.mubr.msk.bf16.gmra.mrb[24].mxu1 %vm758_vm0, %v2345_v39 }
 0x106   : > { %979 = vmatprep.mubr.bf16.mxu0 %v2083_v40  ;;  %1052 = vmatprep.mubr.bf16.mxu1 %v2083_v40 }
 0x10d   : > { %1741 = vmatmul.mubr.msk.bf16.gmra.mrb[28].mxu0 %vm758_vm0, %v2366_v44  ;;  %1745 = vmatmul.mubr.msk.bf16.gmra.mrb[28].mxu1 %vm758_vm0, %v2366_v44 }
 0x10e   : > { %1236 = vmatprep.mubr.bf16.mxu0 %v2083_v40  ;;  %1289 = vmatprep.mubr.bf16.mxu1 %v2083_v40 }
 0x13b   : > { %v2431_v24 = vpop.permute.xlu1 %705 }
 0x13f   : > { %v2435_v26 = vpop.permute.xlu1 %710 }
 0x143   : > { %v2445_v52 = vpop.permute.xlu1 %715 }
 0x146   : > { %v2433_v25 = vpop.permute.xlu0 %700 }
 0x147   : > { %v2455_v17 = vpop.permute.xlu1 %720 }
 0x14a   : > { %v2457_v18 = vpop.permute.xlu0 %725 }
 0x188   : > { %v805_v27 = vpop.f32.mrb[0].mxu0  ;;  %v878_v28 = vpop.f32.mrb[0].mxu1 }
 0x189   : > { %v807_v29 = vpop.f32.mrb[1].mxu0  ;;  %v880_v30 = vpop.f32.mrb[1].mxu1  ;;  %v806_v31 = vadd.f32 %v805_v27, %v2433_v25  ;;  %v879_v32 = vadd.f32 %v878_v28, %v2433_v25 }
 0x18a   : > { %v809_v33 = vpop.f32.mrb[2].mxu0  ;;  %v882_v34 = vpop.f32.mrb[2].mxu1  ;;  %v808_v35 = vadd.f32 %v807_v29, %v2433_v25  ;;  %v881_v36 = vadd.f32 %v880_v30, %v2433_v25 }
 0x18b   : > { %v810_v37 = vadd.f32 %v809_v33, %v2431_v24  ;;  %v883_v38 = vadd.f32 %v882_v34, %v2431_v24  ;;  %v811_v39 = vpop.f32.mrb[3].mxu0  ;;  %v884_v41 = vpop.f32.mrb[3].mxu1  ;;  %v1063_v42 = vmax.f32 %v806_v31, 0.0  ;;  %v1065_v43 = vmax.f32 %v879_v32, 0.0 }
 0x18c   : > { %v812_v44 = vadd.f32 %v811_v39, %v2431_v24  ;;  %v1064_v45 = vmax.f32 %v808_v35, 0.0  ;;  %v885_v46 = vadd.f32 %v884_v41, %v2431_v24  ;;  %v1066_v47 = vmax.f32 %v881_v36, 0.0 }
 0x18d   : > { %v1071_v48 = vmax.f32 %v810_v37, 0.0  ;;  %v1073_v49 = vmax.f32 %v883_v38, 0.0 }
 0x18e   : > { %v1072_v50 = vmax.f32 %v812_v44, 0.0  ;;  %v1074_v51 = vmax.f32 %v885_v46, 0.0 }
 0x18f   : > { %v1131_v53 = vpack.c.bf16 %v1071_v48, %v1063_v42  ;;  %v1133_v54 = vpack.c.bf16 %v1073_v49, %v1065_v43 }
 0x190   : > { %v1132_v55 = vpack.c.bf16 %v1072_v50, %v1064_v45  ;;  %v1134_v56 = vpack.c.bf16 %v1074_v51, %v1066_v47  ;;  %v815_v57 = vpop.f32.mrb[4].mxu0  ;;  %v888_v58 = vpop.f32.mrb[4].mxu1 }
 0x191   : > { %v816_v59 = vadd.f32 %v815_v57, %v2435_v26  ;;  %v889_v60 = vadd.f32 %v888_v58, %v2435_v26  ;;  %v817_v61 = vpop.f32.mrb[5].mxu0  ;;  %v890_v62 = vpop.f32.mrb[5].mxu1 }
 0x192   : > { %v818_v63 = vadd.f32 %v817_v61, %v2435_v26  ;;  %v891_v0 = vadd.f32 %v890_v62, %v2435_v26  ;;  %v819_v1 = vpop.f32.mrb[6].mxu0  ;;  %v892_v2 = vpop.f32.mrb[6].mxu1  ;;  %1204 = vmatprep.subr.bf16.mxu0 %v1132_v55  ;;  %1257 = vmatprep.subr.bf16.mxu1 %v1134_v56 }
 0x193   : > { %v1079_v3 = vmax.f32 %v816_v59, 0.0  ;;  %v1081_v4 = vmax.f32 %v889_v60, 0.0  ;;  %v821_v5 = vpop.f32.mrb[7].mxu0  ;;  %v894_v6 = vpop.f32.mrb[7].mxu1  ;;  %1205 = vmatpush1.bf16.msra.mxu0 %v1131_v53  ;;  %1258 = vmatpush1.bf16.msra.mxu1 %v1133_v54  ;;  %v820_v7 = vadd.f32 %v819_v1, %v2445_v52  ;;  %v893_v8 = vadd.f32 %v892_v2, %v2445_v52 }
 0x194   : > { %v1080_v9 = vmax.f32 %v818_v63, 0.0  ;;  %v1082_v10 = vmax.f32 %v891_v0, 0.0  ;;  %v822_v11 = vadd.f32 %v821_v5, %v2445_v52  ;;  %v895_v12 = vadd.f32 %v894_v6, %v2445_v52  ;;  %v2467_v51 = vpop.permute.xlu1 %730  ;;  %v2469_v53 = vpop.permute.xlu0 %735 }
 0x195   : > { %v1087_v13 = vmax.f32 %v820_v7, 0.0  ;;  %v1089_v14 = vmax.f32 %v893_v8, 0.0 }
 0x196   : > { %v1088_v15 = vmax.f32 %v822_v11, 0.0  ;;  %v1090_v16 = vmax.f32 %v895_v12, 0.0 }
 0x197   : > { %v1139_v19 = vpack.c.bf16 %v1087_v13, %v1079_v3  ;;  %v1141_v20 = vpack.c.bf16 %v1089_v14, %v1081_v4 }
 0x198   : > { %v1140_v21 = vpack.c.bf16 %v1088_v15, %v1080_v9  ;;  %v1142_v22 = vpack.c.bf16 %v1090_v16, %v1082_v10  ;;  %v825_v23 = vpop.f32.mrb[8].mxu0  ;;  %v898_v27 = vpop.f32.mrb[8].mxu1 }
 0x199   : > { %v827_v28 = vpop.f32.mrb[9].mxu0  ;;  %v900_v29 = vpop.f32.mrb[9].mxu1  ;;  %v826_v30 = vadd.f32 %v825_v23, %v2455_v17  ;;  %v899_v31 = vadd.f32 %v898_v27, %v2455_v17  ;;  %v2482_v27 = vld [vmem:[%s2700_s3] sm:$0xff]  }
 0x19a   : > { %v829_v32 = vpop.f32.mrb[10].mxu0  ;;  %v902_v33 = vpop.f32.mrb[10].mxu1  ;;  %v828_v34 = vadd.f32 %v827_v28, %v2455_v17  ;;  %v901_v35 = vadd.f32 %v900_v29, %v2455_v17  ;;  %1206 = vmatprep.subr.bf16.mxu0 %v1140_v21  ;;  %1259 = vmatprep.subr.bf16.mxu1 %v1142_v22  ;;  %v2493_v28 = vld [vmem:[%s2700_s3 + $0x8] sm:$0xff]  }
 0x19b   : > { %v831_v36 = vpop.f32.mrb[11].mxu0  ;;  %v904_v37 = vpop.f32.mrb[11].mxu1  ;;  %1207 = vmatpush1.bf16.msra.mxu0 %v1139_v19  ;;  %1260 = vmatpush1.bf16.msra.mxu1 %v1141_v20  ;;  %v830_v38 = vadd.f32 %v829_v32, %v2457_v18  ;;  %v1095_v39 = vmax.f32 %v826_v30, 0.0  ;;  %v903_v41 = vadd.f32 %v902_v33, %v2457_v18  ;;  %v1097_v42 = vmax.f32 %v899_v31, 0.0 }
 0x19c   : > { %v832_v43 = vadd.f32 %v831_v36, %v2457_v18  ;;  %v1096_v44 = vmax.f32 %v828_v34, 0.0  ;;  %v905_v45 = vadd.f32 %v904_v37, %v2457_v18  ;;  %v1098_v46 = vmax.f32 %v901_v35, 0.0 }
 0x19d   : > { %v1103_v47 = vmax.f32 %v830_v38, 0.0  ;;  %v1105_v48 = vmax.f32 %v903_v41, 0.0 }
 0x19e   : > { %v1104_v49 = vmax.f32 %v832_v43, 0.0  ;;  %v1106_v50 = vmax.f32 %v905_v45, 0.0 }
 0x19f   : > { %v1147_v54 = vpack.c.bf16 %v1103_v47, %v1095_v39  ;;  %v1149_v55 = vpack.c.bf16 %v1105_v48, %v1097_v42 }
 0x1a0   : > { %v1148_v56 = vpack.c.bf16 %v1104_v49, %v1096_v44  ;;  %v1150_v57 = vpack.c.bf16 %v1106_v50, %v1098_v46  ;;  %v835_v58 = vpop.f32.mrb[12].mxu0  ;;  %v908_v59 = vpop.f32.mrb[12].mxu1 }
 0x1a1   : > { %v837_v60 = vpop.f32.mrb[13].mxu0  ;;  %v910_v61 = vpop.f32.mrb[13].mxu1  ;;  %v836_v62 = vadd.f32 %v835_v58, %v2467_v51  ;;  %v909_v63 = vadd.f32 %v908_v59, %v2467_v51 }
 0x1a2   : > { %v839_v0 = vpop.f32.mrb[14].mxu0  ;;  %v912_v1 = vpop.f32.mrb[14].mxu1  ;;  %v838_v2 = vadd.f32 %v837_v60, %v2467_v51  ;;  %v911_v3 = vadd.f32 %v910_v61, %v2467_v51  ;;  %1208 = vmatprep.subr.bf16.mxu0 %v1148_v56  ;;  %1261 = vmatprep.subr.bf16.mxu1 %v1150_v57 }
 0x1a3   : > { %v841_v4 = vpop.f32.mrb[15].mxu0  ;;  %v914_v5 = vpop.f32.mrb[15].mxu1  ;;  %1209 = vmatpush1.bf16.msra.mxu0 %v1147_v54  ;;  %1262 = vmatpush1.bf16.msra.mxu1 %v1149_v55  ;;  %v840_v6 = vadd.f32 %v839_v0, %v2469_v53  ;;  %v1111_v7 = vmax.f32 %v836_v62, 0.0  ;;  %v913_v8 = vadd.f32 %v912_v1, %v2469_v53  ;;  %v1113_v9 = vmax.f32 %v909_v63, 0.0 }
 0x1a4   : > { %v842_v10 = vadd.f32 %v841_v4, %v2469_v53  ;;  %v1112_v11 = vmax.f32 %v838_v2, 0.0  ;;  %v915_v12 = vadd.f32 %v914_v5, %v2469_v53  ;;  %v1114_v13 = vmax.f32 %v911_v3, 0.0 }
 0x1a5   : > { %v1119_v14 = vmax.f32 %v840_v6, 0.0  ;;  %v1121_v15 = vmax.f32 %v913_v8, 0.0 }
 0x1a6   : > { %v1120_v16 = vmax.f32 %v842_v10, 0.0  ;;  %v1122_v19 = vmax.f32 %v915_v12, 0.0 }
 0x1a7   : > { %v1155_v20 = vpack.c.bf16 %v1119_v14, %v1111_v7  ;;  %v1157_v21 = vpack.c.bf16 %v1121_v15, %v1113_v9 }
 0x1a8   : > { %v1156_v22 = vpack.c.bf16 %v1120_v16, %v1112_v11  ;;  %v1158_v23 = vpack.c.bf16 %v1122_v19, %v1114_v13 }
 0x1aa   : > { %1210 = vmatprep.subr.bf16.mxu0 %v1156_v22  ;;  %1263 = vmatprep.subr.bf16.mxu1 %v1158_v23 }
 0x1ab   : > { %1211 = vmatpush1.bf16.msra.mxu0 %v1155_v20  ;;  %1264 = vmatpush1.bf16.msra.mxu1 %v1157_v21 }
 0x1ae   : > { %1748 = vmatmul.mubr.msk.bf16.vlgmr.msra.gmra.mrb[32].mxu0 %vm1197_vm1, %v2482_v27  ;;  %1750 = vmatmul.mubr.msk.bf16.vlgmr.msra.gmra.mrb[32].mxu1 %vm1197_vm1, %v2482_v27 }
 0x1af   : > { %1246 = vmatprep.mubr.bf16.mxu0 %v2083_v40  ;;  %1299 = vmatprep.mubr.bf16.mxu1 %v2083_v40 }
 0x1b6   : > { %1749 = vmatmul.mubr.msk.bf16.gmra.mrb[36].mxu0 %vm1197_vm1, %v2493_v28  ;;  %1751 = vmatmul.mubr.msk.bf16.gmra.mrb[36].mxu1 %vm1197_vm1, %v2493_v28 }
 0x1b7   : > { %1342 = vmatprep.mubr.bf16.mxu0 %v2083_v40  ;;  %1395 = vmatprep.mubr.bf16.mxu1 %v2083_v40 }
 0x1c8   : > { %v951_v29 = vpop.f32.mrb[16].mxu0  ;;  %v1024_v30 = vpop.f32.mrb[16].mxu1 }
 0x1c9   : > { %v952_v31 = vadd.f32 %v951_v29, %v2433_v25  ;;  %v1025_v32 = vadd.f32 %v1024_v30, %v2433_v25  ;;  %v953_v33 = vpop.f32.mrb[17].mxu0  ;;  %v1026_v34 = vpop.f32.mrb[17].mxu1 }
 0x1ca   : > { %v954_v35 = vadd.f32 %v953_v33, %v2433_v25  ;;  %v1027_v36 = vadd.f32 %v1026_v34, %v2433_v25  ;;  %v955_v37 = vpop.f32.mrb[18].mxu0  ;;  %v1028_v38 = vpop.f32.mrb[18].mxu1 }
 0x1cb   : > { %v956_v39 = vadd.f32 %v955_v37, %v2431_v24  ;;  %v1029_v41 = vadd.f32 %v1028_v38, %v2431_v24  ;;  %v957_v42 = vpop.f32.mrb[19].mxu0  ;;  %v1030_v43 = vpop.f32.mrb[19].mxu1  ;;  %v1067_v46 = vmax.f32 %v952_v31, 0.0  ;;  %v1069_v47 = vmax.f32 %v1025_v32, 0.0 }
 0x1cc   : > { %v958_v44 = vadd.f32 %v957_v42, %v2431_v24  ;;  %v1031_v45 = vadd.f32 %v1030_v43, %v2431_v24  ;;  %v1068_v50 = vmax.f32 %v954_v35, 0.0  ;;  %v1070_v54 = vmax.f32 %v1027_v36, 0.0 }
 0x1cd   : > { %v1075_v48 = vmax.f32 %v956_v39, 0.0  ;;  %v1077_v49 = vmax.f32 %v1029_v41, 0.0 }
 0x1ce   : > { %v1076_v55 = vmax.f32 %v958_v44, 0.0  ;;  %v1078_v25 = vmax.f32 %v1031_v45, 0.0 }
 0x1cf   : > { %v1135_v56 = vpack.c.bf16 %v1075_v48, %v1067_v46  ;;  %v1137_v57 = vpack.c.bf16 %v1077_v49, %v1069_v47 }
 0x1d0   : > { %v1136_v58 = vpack.c.bf16 %v1076_v55, %v1068_v50  ;;  %v1138_v59 = vpack.c.bf16 %v1078_v25, %v1070_v54  ;;  %v961_v60 = vpop.f32.mrb[20].mxu0  ;;  %v1034_v61 = vpop.f32.mrb[20].mxu1 }
 0x1d1   : > { %v962_v62 = vadd.f32 %v961_v60, %v2435_v26  ;;  %v1035_v63 = vadd.f32 %v1034_v61, %v2435_v26  ;;  %v963_v0 = vpop.f32.mrb[21].mxu0  ;;  %v1036_v24 = vpop.f32.mrb[21].mxu1 }
 0x1d2   : > { %v964_v1 = vadd.f32 %v963_v0, %v2435_v26  ;;  %v1037_v2 = vadd.f32 %v1036_v24, %v2435_v26  ;;  %v965_v3 = vpop.f32.mrb[22].mxu0  ;;  %v1038_v4 = vpop.f32.mrb[22].mxu1  ;;  %1310 = vmatprep.subr.bf16.mxu0 %v1136_v58  ;;  %1363 = vmatprep.subr.bf16.mxu1 %v1138_v59 }
 0x1d3   : > { %v966_v5 = vadd.f32 %v965_v3, %v2445_v52  ;;  %v1039_v6 = vadd.f32 %v1038_v4, %v2445_v52  ;;  %v967_v7 = vpop.f32.mrb[23].mxu0  ;;  %v1040_v8 = vpop.f32.mrb[23].mxu1  ;;  %1311 = vmatpush1.bf16.msra.mxu0 %v1135_v56  ;;  %1364 = vmatpush1.bf16.msra.mxu1 %v1137_v57  ;;  %v1083_v11 = vmax.f32 %v962_v62, 0.0  ;;  %v1085_v12 = vmax.f32 %v1035_v63, 0.0 }
 0x1d4   : > { %v968_v9 = vadd.f32 %v967_v7, %v2445_v52  ;;  %v1041_v10 = vadd.f32 %v1040_v8, %v2445_v52  ;;  %v1084_v14 = vmax.f32 %v964_v1, 0.0  ;;  %v1086_v15 = vmax.f32 %v1037_v2, 0.0 }
 0x1d5   : > { %v1091_v13 = vmax.f32 %v966_v5, 0.0  ;;  %v1093_v26 = vmax.f32 %v1039_v6, 0.0 }
 0x1d6   : > { %v1092_v16 = vmax.f32 %v968_v9, 0.0  ;;  %v1094_v19 = vmax.f32 %v1041_v10, 0.0 }
 0x1d7   : > { %v1143_v20 = vpack.c.bf16 %v1091_v13, %v1083_v11  ;;  %v1145_v21 = vpack.c.bf16 %v1093_v26, %v1085_v12 }
 0x1d8   : > { %v1144_v22 = vpack.c.bf16 %v1092_v16, %v1084_v14  ;;  %v1146_v23 = vpack.c.bf16 %v1094_v19, %v1086_v15  ;;  %v971_v29 = vpop.f32.mrb[24].mxu0  ;;  %v1044_v30 = vpop.f32.mrb[24].mxu1 }
 0x1d9   : > { %v972_v31 = vadd.f32 %v971_v29, %v2455_v17  ;;  %v1045_v32 = vadd.f32 %v1044_v30, %v2455_v17  ;;  %v973_v33 = vpop.f32.mrb[25].mxu0  ;;  %v1046_v52 = vpop.f32.mrb[25].mxu1 }
 0x1da   : > { %v974_v34 = vadd.f32 %v973_v33, %v2455_v17  ;;  %v1047_v35 = vadd.f32 %v1046_v52, %v2455_v17  ;;  %v975_v36 = vpop.f32.mrb[26].mxu0  ;;  %v1048_v37 = vpop.f32.mrb[26].mxu1  ;;  %1312 = vmatprep.subr.bf16.mxu0 %v1144_v22  ;;  %1365 = vmatprep.subr.bf16.mxu1 %v1146_v23 }
 0x1db   : > { %v976_v38 = vadd.f32 %v975_v36, %v2457_v18  ;;  %v1049_v39 = vadd.f32 %v1048_v37, %v2457_v18  ;;  %v977_v41 = vpop.f32.mrb[27].mxu0  ;;  %v1050_v42 = vpop.f32.mrb[27].mxu1  ;;  %1313 = vmatpush1.bf16.msra.mxu0 %v1143_v20  ;;  %1366 = vmatpush1.bf16.msra.mxu1 %v1145_v21  ;;  %v1099_v45 = vmax.f32 %v972_v31, 0.0  ;;  %v1101_v46 = vmax.f32 %v1045_v32, 0.0 }
 0x1dc   : > { %v978_v43 = vadd.f32 %v977_v41, %v2457_v18  ;;  %v1051_v44 = vadd.f32 %v1050_v42, %v2457_v18  ;;  %v1100_v48 = vmax.f32 %v974_v34, 0.0  ;;  %v1102_v49 = vmax.f32 %v1047_v35, 0.0  ;;  %v2545_v20 = vpop.permute.xlu1 %1169 }
 0x1dd   : > { %v1107_v47 = vmax.f32 %v976_v38, 0.0  ;;  %v1109_v17 = vmax.f32 %v1049_v39, 0.0 }
 0x1de   : > { %v1108_v50 = vmax.f32 %v978_v43, 0.0  ;;  %v1110_v54 = vmax.f32 %v1051_v44, 0.0 }
 0x1df   : > { %v1151_v55 = vpack.c.bf16 %v1107_v47, %v1099_v45  ;;  %v1153_v25 = vpack.c.bf16 %v1109_v17, %v1101_v46 }
 0x1e0   : > { %v1152_v56 = vpack.c.bf16 %v1108_v50, %v1100_v48  ;;  %v1154_v57 = vpack.c.bf16 %v1110_v54, %v1102_v49  ;;  %v981_v58 = vpop.f32.mrb[28].mxu0  ;;  %v1054_v59 = vpop.f32.mrb[28].mxu1 }
 0x1e1   : > { %v982_v60 = vadd.f32 %v981_v58, %v2467_v51  ;;  %v1055_v61 = vadd.f32 %v1054_v59, %v2467_v51  ;;  %v983_v62 = vpop.f32.mrb[29].mxu0  ;;  %v1056_v18 = vpop.f32.mrb[29].mxu1 }
 0x1e2   : > { %v984_v63 = vadd.f32 %v983_v62, %v2467_v51  ;;  %v1057_v0 = vadd.f32 %v1056_v18, %v2467_v51  ;;  %v985_v24 = vpop.f32.mrb[30].mxu0  ;;  %v1058_v1 = vpop.f32.mrb[30].mxu1  ;;  %1314 = vmatprep.subr.bf16.mxu0 %v1152_v56  ;;  %1367 = vmatprep.subr.bf16.mxu1 %v1154_v57 }
 0x1e3   : > { %v986_v2 = vadd.f32 %v985_v24, %v2469_v53  ;;  %v1059_v3 = vadd.f32 %v1058_v1, %v2469_v53  ;;  %v987_v4 = vpop.f32.mrb[31].mxu0  ;;  %v1060_v5 = vpop.f32.mrb[31].mxu1  ;;  %1315 = vmatpush1.bf16.msra.mxu0 %v1151_v55  ;;  %1368 = vmatpush1.bf16.msra.mxu1 %v1153_v25  ;;  %v1115_v8 = vmax.f32 %v982_v60, 0.0  ;;  %v1117_v9 = vmax.f32 %v1055_v61, 0.0 }
 0x1e4   : > { %v988_v6 = vadd.f32 %v987_v4, %v2469_v53  ;;  %v1061_v7 = vadd.f32 %v1060_v5, %v2469_v53  ;;  %v1116_v11 = vmax.f32 %v984_v63, 0.0  ;;  %v1118_v12 = vmax.f32 %v1057_v0, 0.0  ;;  %v2543_v53 = vpop.permute.xlu0 %1174  ;;  %v2549_v22 = vpop.permute.xlu1 %1179 }
 0x1e5   : > { %v1123_v10 = vmax.f32 %v986_v2, 0.0  ;;  %v1125_v51 = vmax.f32 %v1059_v3, 0.0 }
 0x1e6   : > { %v1124_v13 = vmax.f32 %v988_v6, 0.0  ;;  %v1126_v26 = vmax.f32 %v1061_v7, 0.0 }
 0x1e7   : > { %v1159_v14 = vpack.c.bf16 %v1123_v10, %v1115_v8  ;;  %v1161_v15 = vpack.c.bf16 %v1125_v51, %v1117_v9 }
 0x1e8   : > { %v1160_v16 = vpack.c.bf16 %v1124_v13, %v1116_v11  ;;  %v1162_v19 = vpack.c.bf16 %v1126_v26, %v1118_v12  ;;  %v2547_v21 = vpop.permute.xlu0 %1184  ;;  %v2561_v17 = vpop.permute.xlu1 %1454 }
 0x1ea   : > { %1316 = vmatprep.subr.bf16.mxu0 %v1160_v16  ;;  %1369 = vmatprep.subr.bf16.mxu1 %v1162_v19 }
 0x1eb   : > { %1317 = vmatpush1.bf16.msra.mxu0 %v1159_v14  ;;  %1370 = vmatpush1.bf16.msra.mxu1 %v1161_v15 }
 0x1ec   : > { %v2559_v47 = vpop.permute.xlu0 %1459  ;;  %v2577_v13 = vpop.permute.xlu1 %1464 }
 0x1ee   : > { %1752 = vmatmul.mubr.msk.bf16.vlgmr.msra.gmra.mrb[40].mxu0 %vm1197_vm1, %v2482_v27  ;;  %1754 = vmatmul.mubr.msk.bf16.vlgmr.msra.gmra.mrb[40].mxu1 %vm1197_vm1, %v2482_v27 }
 0x1ef   : > { %1352 = vmatprep.mubr.bf16.mxu0 %v2083_v40  ;;  %1405 = vmatprep.mubr.bf16.mxu1 %v2083_v40 }
 0x1f6   : > { %1753 = vmatmul.mubr.msk.bf16.gmra.mrb[44].mxu0 %vm1197_vm1, %v2493_v28  ;;  %1755 = vmatmul.mubr.msk.bf16.gmra.mrb[44].mxu1 %vm1197_vm1, %v2493_v28 }
 0x281   : > { %v1238_v23 = vpop.f32.mrb[32].mxu0  ;;  %v1291_v27 = vpop.f32.mrb[32].mxu1 }
 0x282   : > { %v1239_v29 = vadd.f32 %v1238_v23, %v2545_v20  ;;  %v1292_v40 = vadd.f32 %v1291_v27, %v2545_v20  ;;  %v1240_v30 = vpop.f32.mrb[33].mxu0  ;;  %v1293_v31 = vpop.f32.mrb[33].mxu1 }
 0x283   : > { %v1241_v32 = vadd.f32 %v1240_v30, %v2545_v20  ;;  %v1294_v28 = vadd.f32 %v1293_v31, %v2545_v20  ;;  %v1242_v33 = vpop.f32.mrb[34].mxu0  ;;  %v1295_v52 = vpop.f32.mrb[34].mxu1 }
 0x284   : > { %v1416_v34 = vmax.f32 %v1239_v29, 0.0  ;;  %v1418_v35 = vmax.f32 %v1292_v40, 0.0  ;;  %v1243_v36 = vadd.f32 %v1242_v33, %v2543_v53  ;;  %v1296_v37 = vadd.f32 %v1295_v52, %v2543_v53  ;;  %v1244_v38 = vpop.f32.mrb[35].mxu0  ;;  %v1297_v39 = vpop.f32.mrb[35].mxu1 }
 0x285   : > { %v1417_v41 = vmax.f32 %v1241_v32, 0.0  ;;  %v1419_v42 = vmax.f32 %v1294_v28, 0.0  ;;  %v1245_v43 = vadd.f32 %v1244_v38, %v2543_v53  ;;  %v1298_v44 = vadd.f32 %v1297_v39, %v2543_v53  ;;  %v2583_v40 = vpop.permute.xlu0 %1469 }
 0x286   : > { %v1424_v45 = vmax.f32 %v1243_v36, 0.0  ;;  %v1426_v46 = vmax.f32 %v1296_v37, 0.0  ;;  %v1472_v50 = vmul.f32 %v2561_v17, %v1416_v34  ;;  %v1474_v54 = vmul.f32 %v2561_v17, %v1418_v35 }
 0x287   : > { %v1425_v48 = vmax.f32 %v1245_v43, 0.0  ;;  %v1427_v49 = vmax.f32 %v1298_v44, 0.0  ;;  %v1473_v56 = vmul.f32 %v2561_v17, %v1417_v41  ;;  %v1475_v57 = vmul.f32 %v2561_v17, %v1419_v42 }
 0x288   : > { %v1480_v55 = vmul.f32 %v2559_v47, %v1424_v45  ;;  %v1482_v25 = vmul.f32 %v2559_v47, %v1426_v46 }
 0x289   : > { %v1481_v58 = vmul.f32 %v2559_v47, %v1425_v48  ;;  %v1483_v59 = vmul.f32 %v2559_v47, %v1427_v49  ;;  %v1248_v60 = vpop.f32.mrb[36].mxu0  ;;  %v1301_v61 = vpop.f32.mrb[36].mxu1 }
 0x28a   : > { %v1504_v62 = vadd.f32 %v1480_v55, %v1472_v50  ;;  %v1522_v18 = vadd.f32 %v1482_v25, %v1474_v54  ;;  %v1249_v63 = vadd.f32 %v1248_v60, %v2549_v22  ;;  %v1302_v0 = vadd.f32 %v1301_v61, %v2549_v22  ;;  %v1250_v24 = vpop.f32.mrb[37].mxu0  ;;  %v1303_v1 = vpop.f32.mrb[37].mxu1 }
 0x28b   : > { %v1513_v2 = vadd.f32 %v1481_v58, %v1473_v56  ;;  %v1531_v3 = vadd.f32 %v1483_v59, %v1475_v57  ;;  %v1251_v4 = vadd.f32 %v1250_v24, %v2549_v22  ;;  %v1304_v5 = vadd.f32 %v1303_v1, %v2549_v22  ;;  %v1252_v6 = vpop.f32.mrb[38].mxu0  ;;  %v1305_v7 = vpop.f32.mrb[38].mxu1 }
 0x28c   : > { %v1432_v8 = vmax.f32 %v1249_v63, 0.0  ;;  %v1434_v9 = vmax.f32 %v1302_v0, 0.0  ;;  %v1253_v10 = vadd.f32 %v1252_v6, %v2547_v21  ;;  %v1306_v51 = vadd.f32 %v1305_v7, %v2547_v21  ;;  %v1254_v11 = vpop.f32.mrb[39].mxu0  ;;  %v1307_v12 = vpop.f32.mrb[39].mxu1 }
 0x28d   : > { %v1433_v26 = vmax.f32 %v1251_v4, 0.0  ;;  %v1435_v14 = vmax.f32 %v1304_v5, 0.0  ;;  %v1255_v15 = vadd.f32 %v1254_v11, %v2547_v21  ;;  %v1308_v16 = vadd.f32 %v1307_v12, %v2547_v21 }
 0x28e   : > { %v1488_v19 = vmul.f32 %v2577_v13, %v1432_v8  ;;  %v1490_v23 = vmul.f32 %v2577_v13, %v1434_v9  ;;  %v1440_v27 = vmax.f32 %v1253_v10, 0.0  ;;  %v1442_v29 = vmax.f32 %v1306_v51, 0.0 }
 0x28f   : > { %v1489_v30 = vmul.f32 %v2577_v13, %v1433_v26  ;;  %v1491_v31 = vmul.f32 %v2577_v13, %v1435_v14  ;;  %v1441_v32 = vmax.f32 %v1255_v15, 0.0  ;;  %v1443_v28 = vmax.f32 %v1308_v16, 0.0 }
 0x290   : > { %v1505_v33 = vadd.f32 %v1504_v62, %v1488_v19  ;;  %v1523_v52 = vadd.f32 %v1522_v18, %v1490_v23  ;;  %v1496_v34 = vmul.f32 %v2583_v40, %v1440_v27  ;;  %v1498_v35 = vmul.f32 %v2583_v40, %v1442_v29 }
 0x291   : > { %v1514_v36 = vadd.f32 %v1513_v2, %v1489_v30  ;;  %v1532_v37 = vadd.f32 %v1531_v3, %v1491_v31  ;;  %v1497_v38 = vmul.f32 %v2583_v40, %v1441_v32  ;;  %v1499_v39 = vmul.f32 %v2583_v40, %v1443_v28 }
 0x292   : > { %v1506_v41 = vadd.f32 %v1505_v33, %v1496_v34  ;;  %v1524_v42 = vadd.f32 %v1523_v52, %v1498_v35  ;;  %v2084_v60 = vmov 1966171168   ;;  %v1601_v62 = vlaneseq }
 0x293   : > { %v1515_v43 = vadd.f32 %v1514_v36, %v1497_v38  ;;  %v1533_v44 = vadd.f32 %v1532_v37, %v1499_v39  ;;  %v1599_v61 = vunpack.c.l.s4 %v2084_v60  ;;  %v2591_v2 = vstv %s1576_s19 }
 0x294   : > { %v1507_v45 = vrot.slane %v1506_v41, 4  ;;  %v1525_v46 = vrot.slane %v1524_v42, 4  ;;  %v1602_v7 = vshrl.u32 %v1601_v62, 7 }
 0x295   : > { %v1516_v48 = vrot.slane %v1515_v43, 4  ;;  %v1534_v49 = vrot.slane %v1533_v44, 4  ;;  %v1600_v6 = vunpack.c.0.s8 %v1599_v61 }
 0x296   : > { %v1508_v50 = vadd.f32 %v1507_v45, %v1506_v41  ;;  %v1526_v54 = vadd.f32 %v1525_v46, %v1524_v42 }
 0x297   : > { %v1517_v55 = vadd.f32 %v1516_v48, %v1515_v43  ;;  %v1535_v25 = vadd.f32 %v1534_v49, %v1533_v44  ;;  %v2597_v15 = vsub.s32 %v1600_v6, %v1602_v7 }
 0x298   : > { %v1509_v56 = vrot.slane %v1508_v50, 2  ;;  %v1527_v57 = vrot.slane %v1526_v54, 2 }
 0x299   : > { %v1518_v58 = vrot.slane %v1517_v55, 2  ;;  %v1536_v59 = vrot.slane %v1535_v25, 2 }
 0x29a   : > { %v1510_v18 = vadd.f32 %v1509_v56, %v1508_v50  ;;  %v1528_v63 = vadd.f32 %v1527_v57, %v1526_v54 }
 0x29b   : > { %v1519_v0 = vadd.f32 %v1518_v58, %v1517_v55  ;;  %v1537_v24 = vadd.f32 %v1536_v59, %v1535_v25 }
 0x29c   : > { %v1511_v1 = vrot.slane %v1510_v18, 1  ;;  %v1529_v3 = vrot.slane %v1528_v63, 1 }
 0x29d   : > { %v1520_v4 = vrot.slane %v1519_v0, 1  ;;  %v1538_v5 = vrot.slane %v1537_v24, 1 }
 0x29e   : > { %v1512_v8 = vadd.f32 %v1511_v1, %v1510_v18  ;;  %v1530_v9 = vadd.f32 %v1529_v3, %v1528_v63 }
 0x29f   : > { %v1521_v10 = vadd.f32 %v1520_v4, %v1519_v0  ;;  %v1539_v51 = vadd.f32 %v1538_v5, %v1537_v24 }
 0x2a0   : > { %v1578_v11 = vadd.f32 %v2591_v2, %v1512_v8  ;;  %v1580_v12 = vadd.f32 %v2591_v2, %v1530_v9 }
 0x2a1   : > { %v1579_v26 = vadd.f32 %v2591_v2, %v1521_v10  ;;  %v1581_v14 = vadd.f32 %v2591_v2, %v1539_v51 }
 0x2a3   : > { %v1594_v16 = vcombine.low %v1578_v11, %v1579_v26  ;;  %v1595_v19 = vcombine.low %v1580_v12, %v1581_v14 }
 0x2a5   : > { %v2600_v23 = vrot.slane %v1594_v16, %v2597_v15  ;;  %v2603_v27 = vrot.slane %v1595_v19, %v2597_v15 }
 0x2a7   : > { %v1626_v29 = vcombine.low %v2600_v23, %v2603_v27 }
 0x2c1   : > { %v1344_v30 = vpop.f32.mrb[40].mxu0  ;;  %v1397_v31 = vpop.f32.mrb[40].mxu1 }
 0x2c2   : > { %v1345_v32 = vadd.f32 %v1344_v30, %v2545_v20  ;;  %v1398_v28 = vadd.f32 %v1397_v31, %v2545_v20  ;;  %v1346_v33 = vpop.f32.mrb[41].mxu0  ;;  %v1399_v52 = vpop.f32.mrb[41].mxu1 }
 0x2c3   : > { %v1347_v34 = vadd.f32 %v1346_v33, %v2545_v20  ;;  %v1400_v35 = vadd.f32 %v1399_v52, %v2545_v20  ;;  %v1348_v36 = vpop.f32.mrb[42].mxu0  ;;  %v1401_v37 = vpop.f32.mrb[42].mxu1 }
 0x2c4   : > { %v1420_v38 = vmax.f32 %v1345_v32, 0.0  ;;  %v1422_v39 = vmax.f32 %v1398_v28, 0.0  ;;  %v1349_v41 = vadd.f32 %v1348_v36, %v2543_v53  ;;  %v1402_v42 = vadd.f32 %v1401_v37, %v2543_v53  ;;  %v1350_v43 = vpop.f32.mrb[43].mxu0  ;;  %v1403_v44 = vpop.f32.mrb[43].mxu1 }
 0x2c5   : > { %v1421_v45 = vmax.f32 %v1347_v34, 0.0  ;;  %v1423_v46 = vmax.f32 %v1400_v35, 0.0  ;;  %v1351_v48 = vadd.f32 %v1350_v43, %v2543_v53  ;;  %v1404_v49 = vadd.f32 %v1403_v44, %v2543_v53 }
 0x2c6   : > { %v1428_v50 = vmax.f32 %v1349_v41, 0.0  ;;  %v1430_v54 = vmax.f32 %v1402_v42, 0.0  ;;  %v1476_v25 = vmul.f32 %v2561_v17, %v1420_v38  ;;  %v1478_v56 = vmul.f32 %v2561_v17, %v1422_v39 }
 0x2c7   : > { %v1429_v55 = vmax.f32 %v1351_v48, 0.0  ;;  %v1431_v20 = vmax.f32 %v1404_v49, 0.0  ;;  %v1477_v59 = vmul.f32 %v2561_v17, %v1421_v45  ;;  %v1479_v60 = vmul.f32 %v2561_v17, %v1423_v46 }
 0x2c8   : > { %v1484_v57 = vmul.f32 %v2559_v47, %v1428_v50  ;;  %v1486_v58 = vmul.f32 %v2559_v47, %v1430_v54 }
 0x2c9   : > { %v1485_v61 = vmul.f32 %v2559_v47, %v1429_v55  ;;  %v1487_v53 = vmul.f32 %v2559_v47, %v1431_v20  ;;  %v1354_v62 = vpop.f32.mrb[44].mxu0  ;;  %v1407_v18 = vpop.f32.mrb[44].mxu1 }
 0x2ca   : > { %v1540_v63 = vadd.f32 %v1484_v57, %v1476_v25  ;;  %v1558_v0 = vadd.f32 %v1486_v58, %v1478_v56  ;;  %v1355_v24 = vadd.f32 %v1354_v62, %v2549_v22  ;;  %v1408_v1 = vadd.f32 %v1407_v18, %v2549_v22  ;;  %v1356_v3 = vpop.f32.mrb[45].mxu0  ;;  %v1409_v4 = vpop.f32.mrb[45].mxu1 }
 0x2cb   : > { %v1549_v5 = vadd.f32 %v1485_v61, %v1477_v59  ;;  %v1567_v6 = vadd.f32 %v1487_v53, %v1479_v60  ;;  %v1357_v7 = vadd.f32 %v1356_v3, %v2549_v22  ;;  %v1410_v17 = vadd.f32 %v1409_v4, %v2549_v22  ;;  %v1358_v8 = vpop.f32.mrb[46].mxu0  ;;  %v1411_v9 = vpop.f32.mrb[46].mxu1 }
 0x2cc   : > { %v1436_v10 = vmax.f32 %v1355_v24, 0.0  ;;  %v1438_v47 = vmax.f32 %v1408_v1, 0.0  ;;  %v1359_v51 = vadd.f32 %v1358_v8, %v2547_v21  ;;  %v1412_v11 = vadd.f32 %v1411_v9, %v2547_v21  ;;  %v1360_v12 = vpop.f32.mrb[47].mxu0  ;;  %v1413_v26 = vpop.f32.mrb[47].mxu1 }
 0x2cd   : > { %v1437_v14 = vmax.f32 %v1357_v7, 0.0  ;;  %v1439_v16 = vmax.f32 %v1410_v17, 0.0  ;;  %v1361_v19 = vadd.f32 %v1360_v12, %v2547_v21  ;;  %v1414_v30 = vadd.f32 %v1413_v26, %v2547_v21 }
 0x2ce   : > { %v1492_v31 = vmul.f32 %v2577_v13, %v1436_v10  ;;  %v1494_v22 = vmul.f32 %v2577_v13, %v1438_v47  ;;  %v1444_v32 = vmax.f32 %v1359_v51, 0.0  ;;  %v1446_v28 = vmax.f32 %v1412_v11, 0.0 }
 0x2cf   : > { %v1493_v33 = vmul.f32 %v2577_v13, %v1437_v14  ;;  %v1495_v52 = vmul.f32 %v2577_v13, %v1439_v16  ;;  %v1445_v34 = vmax.f32 %v1361_v19, 0.0  ;;  %v1447_v35 = vmax.f32 %v1414_v30, 0.0 }
 0x2d0   : > { %v1541_v36 = vadd.f32 %v1540_v63, %v1492_v31  ;;  %v1559_v37 = vadd.f32 %v1558_v0, %v1494_v22  ;;  %v1500_v38 = vmul.f32 %v2583_v40, %v1444_v32  ;;  %v1502_v39 = vmul.f32 %v2583_v40, %v1446_v28 }
 0x2d1   : > { %v1550_v41 = vadd.f32 %v1549_v5, %v1493_v33  ;;  %v1568_v21 = vadd.f32 %v1567_v6, %v1495_v52  ;;  %v1501_v42 = vmul.f32 %v2583_v40, %v1445_v34  ;;  %v1503_v43 = vmul.f32 %v2583_v40, %v1447_v35 }
 0x2d2   : > { %v1542_v44 = vadd.f32 %v1541_v36, %v1500_v38  ;;  %v1560_v45 = vadd.f32 %v1559_v37, %v1502_v39  ;;  %v1634_v12 = vrot.slane %v1626_v29, %v2597_v15 }
 0x2d3   : > { %v1551_v46 = vadd.f32 %v1550_v41, %v1501_v42  ;;  %v1569_v48 = vadd.f32 %v1568_v21, %v1503_v43 }
 0x2d4   : > { %v1543_v49 = vrot.slane %v1542_v44, 4  ;;  %v1561_v13 = vrot.slane %v1560_v45, 4 }
 0x2d5   : > { %v1552_v50 = vrot.slane %v1551_v46, 4  ;;  %v1570_v54 = vrot.slane %v1569_v48, 4 }
 0x2d6   : > { %v1544_v55 = vadd.f32 %v1543_v49, %v1542_v44  ;;  %v1562_v20 = vadd.f32 %v1561_v13, %v1560_v45 }
 0x2d7   : > { %v1553_v25 = vadd.f32 %v1552_v50, %v1551_v46  ;;  %v1571_v56 = vadd.f32 %v1570_v54, %v1569_v48 }
 0x2d8   : > { %v1545_v57 = vrot.slane %v1544_v55, 2  ;;  %v1563_v58 = vrot.slane %v1562_v20, 2 }
 0x2d9   : > { %v1554_v59 = vrot.slane %v1553_v25, 2  ;;  %v1572_v60 = vrot.slane %v1571_v56, 2 }
 0x2da   : > { %v1546_v61 = vadd.f32 %v1545_v57, %v1544_v55  ;;  %v1564_v53 = vadd.f32 %v1563_v58, %v1562_v20 }
 0x2db   : > { %v1555_v40 = vadd.f32 %v1554_v59, %v1553_v25  ;;  %v1573_v62 = vadd.f32 %v1572_v60, %v1571_v56 }
 0x2dc   : > { %v1547_v18 = vrot.slane %v1546_v61, 1  ;;  %v1565_v63 = vrot.slane %v1564_v53, 1 }
 0x2dd   : > { %v1556_v0 = vrot.slane %v1555_v40, 1  ;;  %v1574_v24 = vrot.slane %v1573_v62, 1 }
 0x2de   : > { %v1548_v1 = vadd.f32 %v1547_v18, %v1546_v61  ;;  %v1566_v3 = vadd.f32 %v1565_v63, %v1564_v53 }
 0x2df   : > { %v1557_v4 = vadd.f32 %v1556_v0, %v1555_v40  ;;  %v1575_v5 = vadd.f32 %v1574_v24, %v1573_v62 }
 0x2e0   : > { %v1582_v6 = vadd.f32 %v2591_v2, %v1548_v1  ;;  %v1584_v7 = vadd.f32 %v2591_v2, %v1566_v3 }
 0x2e1   : > { %v1583_v17 = vadd.f32 %v2591_v2, %v1557_v4  ;;  %v1585_v8 = vadd.f32 %v2591_v2, %v1575_v5 }
 0x2e3   : > { %v1596_v9 = vcombine.low %v1582_v6, %v1583_v17  ;;  %v1597_v10 = vcombine.low %v1584_v7, %v1585_v8 }
 0x2e5   : > { %v1618_v47 = vrot.slane %v1596_v9, %v2597_v15  ;;  %v1625_v51 = vrot.slane %v1597_v10, %v2597_v15 }
 0x2e7   : > { %v1627_v11 = vcombine.low %v1618_v47, %v1625_v51 }
 0x2e9   : > { %v1641_v26 = vrot.slane %v1627_v11, %v2597_v15 }
 0x2eb   : > { %v1642_v14 = vcombine.low %v1634_v12, %v1641_v26 }
 0x2ed   : > { %1644 = vst [vmem:[%s273_s22] sm:$0xff] %v1642_v14 }
 0x2ee   : > { %2032 = shalt.err (!%p2029_p3)
}
 0x2ef   : > { %s2033_s14 = scalar_lea.hbm %s2655_s6, 128  ;;  %s2037_s19 = scalar_lea.hbm %s2704_s7, 256 }
 0x2f0   : > { %p2034_p4 = scmp.ne.s32.totalorder %s2655_s6, %s2033_s14  ;;  %p2038_p9 = scmp.lt.u32.totalorder %s2655_s6, %s2704_s7 }
 0x2f1   : > { %p2039_p10 = scmp.lt.u32.totalorder %s2037_s19, %s2033_s14  ;;  %p2041_p12 = scmp.lt.u32.totalorder %s2033_s14, %s2655_s6 }
 0x2f2   : > { %p2035_p7 = pnand %p2034_p4, %p2164_p5 }
 0x2f3   : > { %p2040_p11 = por %p2039_p10, %p2038_p9 }
 0x2f4   : > { %p2036_p8 = pneg %p2035_p7 }
 0x2f5   : > { %p2042_p13 = por %p2041_p12, %p2040_p11 }
 0x2f7   : > { %p2043_p0 = pnand %p2042_p13, %p2036_p8 }
 0x2f9   : > { %2046 = shalt.err (!%p2043_p0)
}
 0x2fa   : > { %1762 = dma.vmem_to_hbm [thread:$0]  (%p2164_p5), %s2657_s23, 128, %s2655_s6, %s1646_s30  }
 0x2fb PF: > { %p1768_p1 = scmp.ge.s32.totalorder %s2081_s29, 2  ;;  %s1672_s22 = sand.u32 1, %s2069_s26  }
 0x2fc   : > { %s1673_s24 = scalar_lea.sflag [#allocation4], %s1672_s22 }
 0x2fd   : > { %p1765_p2 = pnand %p1768_p1, %p2168_p6 }
 0x2ff   : > { %2064 = dma.done.wait (!%p1765_p2), %s1673_s24, 128  }
 0x300   : > { %2066 = vsyncadd (!%p1765_p2), %s1673_s24, 4294967168  ;;  %p18_p3 = scmp.ge.s32.totalorder %s2152_s8, 4   ;;  %s2707_s26 = smov %s2073_s27 }
 0x301   : > { %s2708_s27 = smov %s2077_s28  ;;  %s2709_s28 = smov %s2162_s11 }
 0x302   : > { %s2710_s29 = smov %s2152_s8  ;;  %20 = sbr.rel (!%p18_p3) target bundleno = 5 (0x5), region = 83 }
 0x309   :  { %1678 = vsyncpa [#allocation4], 1 }
 0x30a   :  { %1680 = vsyncpa [#allocation4 + $0x1], 1 }

</bundles_post_ra>
